<compile_context>
chip_gen: v7x
topology: tpu7x:2x2x1
jax: 0.10.0
libtpu: 0.0.40
codegen_flags: <defaults>
</compile_context>

<pallas_src>
import functools

import jax
import jax.numpy as jnp
from jax import lax
from jax.experimental import pallas as pl
from jax.experimental.pallas import tpu as pltpu


# ----------------------------- Pallas kernel -------------------------------

def _classifier_kernel(x_ref, w1_ref, b1_ref, w2_ref, b2_ref, w3_ref, b3_ref,
                       o_ref):
    """Fused 1x1-conv MLP over one (channels x pixel-tile) block.

    x_ref  : [C_in, TP]  bf16   channels on sublanes, pixels on lanes
    w1_ref : [128, C_in] bf16   conv1 weight (PyTorch [Cout, Cin] layout)
    b1_ref : [128, 1]    f32
    w2_ref : [32, 128]   f32    conv2 weight with BN1 folded in
    b2_ref : [32, 1]     f32
    w3_ref : [32, 1]     f32    conv3 weight (transposed) with BN2 folded in
    b3_ref : [1, 1]      f32
    o_ref  : [1, TP]     f32
    """
    x = x_ref[...]                                                # bf16

    # Conv2d(C_in, 128, 1) + bias, ReLU.  (BN1 folded into w2/b2.)
    h = lax.dot_general(w1_ref[...], x, (((1,), (0,)), ((), ())),
                        preferred_element_type=jnp.float32)       # (128, TP)
    h = jnp.maximum(h + b1_ref[...], 0.0)

    # Conv2d(128, 32, 1) + bias, ReLU.  (BN2 folded into w3/b3.)
    h = lax.dot_general(w2_ref[...], h, (((1,), (0,)), ((), ())),
                        preferred_element_type=jnp.float32)       # (32, TP)
    h = jnp.maximum(h + b2_ref[...], 0.0)

    # Conv2d(32, 1, 1): single output channel -> VPU multiply + sublane reduce
    # (skips a wasteful 1-lane MXU pass; output stays lane-dense).
    o = jnp.sum(h * w3_ref[...], axis=0, keepdims=True) + b3_ref[...]  # (1, TP)
    o_ref[...] = o.astype(o_ref.dtype)


def _choose_pixel_tile(hw, max_tile=2048):
    """Largest pixel tile <= max_tile that is lane-friendly and divides HW."""
    if hw <= max_tile:
        return hw                      # full spatial extent per image
    cap = max_tile - (max_tile % 128)
    for tp in range(cap, 0, -128):
        if hw % tp == 0:
            return tp
    # TODO(synk): HW > max_tile with no multiple-of-128 divisor -> fall back to
    #             one block per image (may need a larger vmem_limit_bytes).
    return hw


def classifier_pallas(feat_nc_p, kparams, *, tile_pixels):
    """feat_nc_p: [N, C_in, HW] bf16 (NCHW with H*W flattened). Returns [N, 1, HW] f32."""
    n, c_in, hw = feat_nc_p.shape
    assert hw % tile_pixels == 0
    w1, b1, w2, b2, w3, b3 = kparams

    def const_spec(a):
        # Full-array, grid-invariant operand (weights / biases stay resident).
        return pl.BlockSpec(a.shape, lambda i, j: (0,) * a.ndim)

    grid = (n, hw // tile_pixels)
    return pl.pallas_call(
        _classifier_kernel,
        out_shape=jax.ShapeDtypeStruct((n, 1, hw), jnp.float32),
        grid=grid,
        in_specs=[
            # Feature block: squeeze batch dim, channels x pixel-tile.
            pl.BlockSpec((None, c_in, tile_pixels), lambda i, j: (i, 0, j)),
            const_spec(w1), const_spec(b1),
            const_spec(w2), const_spec(b2),
            const_spec(w3), const_spec(b3),
        ],
        out_specs=pl.BlockSpec((None, 1, tile_pixels), lambda i, j: (i, 0, j)),
        compiler_params=pltpu.CompilerParams(
            dimension_semantics=("parallel", "parallel"),
            vmem_limit_bytes=48 * 1024 * 1024),
    )(feat_nc_p, w1, b1, w2, b2, w3, b3)


# ------------------------------ Parameters ---------------------------------

def init_params(key, c_in):
    """Raw parameters matching the PyTorch classifier's layer shapes."""
    ks = jax.random.split(key, 16)
    f32 = jnp.float32
    return dict(
        # Conv weights in PyTorch [Cout, Cin] layout (1x1 kernels squeezed).
        w1=0.02 * jax.random.normal(ks[0], (128, c_in), f32),
        b1=0.01 * jax.random.normal(ks[1], (128,), f32),
        w2=0.05 * jax.random.normal(ks[2], (32, 128), f32),
        b2=0.01 * jax.random.normal(ks[3], (32,), f32),
        w3=0.10 * jax.random.normal(ks[4], (1, 32), f32),
        b3=0.01 * jax.random.normal(ks[5], (1,), f32),
        # Eval-mode BatchNorm affine params + running stats (distinct keys).
        g1=1.0 + 0.1 * jax.random.normal(ks[6], (128,), f32),
        be1=0.1 * jax.random.normal(ks[7], (128,), f32),
        m1=0.1 * jax.random.normal(ks[8], (128,), f32),
        v1=1.0 + 0.1 * jax.random.uniform(ks[9], (128,), f32),
        g2=1.0 + 0.1 * jax.random.normal(ks[10], (32,), f32),
        be2=0.1 * jax.random.normal(ks[11], (32,), f32),
        m2=0.1 * jax.random.normal(ks[12], (32,), f32),
        v2=1.0 + 0.1 * jax.random.uniform(ks[13], (32,), f32),
    )


def prepare_kernel_params(raw, eps=1e-5):
    """Fold eval-mode BN into the following conv; cast the big operand to bf16."""
    s1 = raw["g1"] / jnp.sqrt(raw["v1"] + eps)
    t1 = raw["be1"] - raw["m1"] * s1
    s2 = raw["g2"] / jnp.sqrt(raw["v2"] + eps)
    t2 = raw["be2"] - raw["m2"] * s2

    w2f = raw["w2"] * s1[None, :]                       # (32, 128)
    b2f = raw["b2"] + raw["w2"] @ t1                    # (32,)
    w3f = raw["w3"] * s2[None, :]                       # (1, 32)
    b3f = raw["b3"] + raw["w3"] @ t2                    # (1,)

    return (
        raw["w1"].astype(jnp.bfloat16),                 # (128, C_in)  bf16
        raw["b1"].reshape(128, 1).astype(jnp.float32),
        w2f.astype(jnp.float32),                        # (32, 128)
        b2f.reshape(32, 1).astype(jnp.float32),
        w3f.reshape(32, 1).astype(jnp.float32),         # column for VPU reduce
        b3f.reshape(1, 1).astype(jnp.float32),
    )


# ------------------------------ Wrapper ------------------------------------

@functools.partial(jax.jit, static_argnames=("max_tile",))
def datasetdm_forward(features_nchw, kparams, *, max_tile=2048):
    """features_nchw: [N, 960*len(steps), H, W] (bf16) -> logits [N, 1, H, W] f32."""
    n, c, h, w = features_nchw.shape
    feat = features_nchw.reshape(n, c, h * w)           # free reshape, no transpose
    tp = _choose_pixel_tile(h * w, max_tile=max_tile)
    out = classifier_pallas(feat, kparams, tile_pixels=tp)   # [N, 1, HW]
    return out.reshape(n, 1, h, w)


# ------------------------------- Reference ---------------------------------

def reference_forward(features_nchw, raw, eps=1e-5):
    """Pure-JAX classifier (unfolded BN, eval mode), matching the kernel's
    bf16 streaming precision for features / conv1 weight."""
    n, c, h, w = features_nchw.shape
    x = jnp.transpose(features_nchw.astype(jnp.float32), (0, 2, 3, 1)).reshape(-1, c)
    w1 = raw["w1"].astype(jnp.bfloat16).astype(jnp.float32)
    y = jnp.maximum(x @ w1.T + raw["b1"], 0.0)
    y = (y - raw["m1"]) / jnp.sqrt(raw["v1"] + eps) * raw["g1"] + raw["be1"]
    y = jnp.maximum(y @ raw["w2"].T + raw["b2"], 0.0)
    y = (y - raw["m2"]) / jnp.sqrt(raw["v2"] + eps) * raw["g2"] + raw["be2"]
    y = y @ raw["w3"].T + raw["b3"]
    return jnp.transpose(y.reshape(n, h, w, 1), (0, 3, 1, 2))


# --------------------------------- Main -------------------------------------

if __name__ == "__main__":
    key = jax.random.PRNGKey(0)
    k_feat, k_par = jax.random.split(key)

    # Small shapes: batch=2, spatial=16x16, len(t_steps_to_save)=1 -> 960 channels.
    N, H, W = 2, 16, 16
    NUM_STEPS = 1
    C_IN = 960 * NUM_STEPS

    # TODO(synk): extract_features (DiffusionModel + hooks + interpolate) is
    # external; synthesize its concatenated output deterministically, already
    # in the bf16 dtype the kernel streams from HBM.
    features = jax.random.normal(k_feat, (N, C_IN, H, W), jnp.float32).astype(jnp.bfloat16)

    raw_params = init_params(k_par, C_IN)
    kparams = prepare_kernel_params(raw_params)

    out = datasetdm_forward(features, kparams)
    out = jax.block_until_ready(out)

    ref = reference_forward(features, raw_params)
    assert out.shape == (N, 1, H, W), out.shape
    assert jnp.allclose(out, ref, atol=5e-3, rtol=5e-3), float(
        jnp.max(jnp.abs(out - ref)))

    print("KERNEL_OK")
</pallas_src>

<mosaic_0001>
module attributes {stable_mosaic.version = 11 : i64} {
  func.func @_classifier_kernel(%arg0: i32, %arg1: i32, %arg2: memref<1x960x256xbf16, #tpu.memory_space<vmem>>, %arg3: memref<128x960xbf16, #tpu.memory_space<vmem>>, %arg4: memref<128x1xf32, #tpu.memory_space<vmem>>, %arg5: memref<32x128xf32, #tpu.memory_space<vmem>>, %arg6: memref<32x1xf32, #tpu.memory_space<vmem>>, %arg7: memref<32x1xf32, #tpu.memory_space<vmem>>, %arg8: memref<1x1xf32, #tpu.memory_space<vmem>>, %arg9: memref<1x1x256xf32, #tpu.memory_space<vmem>>) attributes {dimension_semantics = [#tpu.dimension_semantics<parallel>, #tpu.dimension_semantics<parallel>], iteration_bounds = array<i64: 2, 1>, scalar_prefetch = 0 : i64, scratch_operands = 0 : i64, tpu.core_type = #tpu.core_type<tc>, window_params = [{transform_indices = @transform_0, window_bounds = array<i64: 1, 960, 256>}, {pipeline_mode = #tpu.pipeline_mode<synchronous>, transform_indices = @transform_1, window_bounds = array<i64: 128, 960>}, {pipeline_mode = #tpu.pipeline_mode<synchronous>, transform_indices = @transform_2, window_bounds = array<i64: 128, 1>}, {pipeline_mode = #tpu.pipeline_mode<synchronous>, transform_indices = @transform_3, window_bounds = array<i64: 32, 128>}, {pipeline_mode = #tpu.pipeline_mode<synchronous>, transform_indices = @transform_4, window_bounds = array<i64: 32, 1>}, {pipeline_mode = #tpu.pipeline_mode<synchronous>, transform_indices = @transform_5, window_bounds = array<i64: 32, 1>}, {pipeline_mode = #tpu.pipeline_mode<synchronous>, transform_indices = @transform_6, window_bounds = array<i64: 1, 1>}, {transform_indices = @transform_7, window_bounds = array<i64: 1, 1, 256>}]} {
    %c0 = arith.constant 0 : index
    %c0_0 = arith.constant 0 : index
    %c0_1 = arith.constant 0 : index
    %0 = vector.load %arg2[%c0, %c0_0, %c0_1] : memref<1x960x256xbf16, #tpu.memory_space<vmem>>, vector<1x960x256xbf16>
    %1 = vector.shape_cast %0 : vector<1x960x256xbf16> to vector<960x256xbf16>
    %c0_2 = arith.constant 0 : index
    %c0_3 = arith.constant 0 : index
    %2 = vector.load %arg3[%c0_2, %c0_3] : memref<128x960xbf16, #tpu.memory_space<vmem>>, vector<128x960xbf16>
    %cst = arith.constant dense<0.000000e+00> : vector<128x256xf32>
    %3 = tpu.matmul %2, %1, %cst {dimension_numbers = #tpu.dot_dimension_numbers<[1], [0], [0], [1], [0, 0, 1, 1], [], []>} : vector<128x960xbf16>, vector<960x256xbf16>, vector<128x256xf32> -> vector<128x256xf32>
    %c0_4 = arith.constant 0 : index
    %c0_5 = arith.constant 0 : index
    %4 = vector.load %arg4[%c0_4, %c0_5] : memref<128x1xf32, #tpu.memory_space<vmem>>, vector<128x1xf32>
    %5 = vector.broadcast %4 : vector<128x1xf32> to vector<128x256xf32>
    %6 = arith.addf %3, %5 : vector<128x256xf32>
    %cst_6 = arith.constant 0.000000e+00 : f32
    %7 = vector.broadcast %cst_6 : f32 to vector<128x256xf32>
    %8 = arith.maximumf %6, %7 : vector<128x256xf32>
    %c0_7 = arith.constant 0 : index
    %c0_8 = arith.constant 0 : index
    %9 = vector.load %arg5[%c0_7, %c0_8] : memref<32x128xf32, #tpu.memory_space<vmem>>, vector<32x128xf32>
    %cst_9 = arith.constant dense<0.000000e+00> : vector<32x256xf32>
    %10 = tpu.matmul %9, %8, %cst_9 {dimension_numbers = #tpu.dot_dimension_numbers<[1], [0], [0], [1], [0, 0, 1, 1], [], []>} : vector<32x128xf32>, vector<128x256xf32>, vector<32x256xf32> -> vector<32x256xf32>
    %c0_10 = arith.constant 0 : index
    %c0_11 = arith.constant 0 : index
    %11 = vector.load %arg6[%c0_10, %c0_11] : memref<32x1xf32, #tpu.memory_space<vmem>>, vector<32x1xf32>
    %12 = vector.broadcast %11 : vector<32x1xf32> to vector<32x256xf32>
    %13 = arith.addf %10, %12 : vector<32x256xf32>
    %cst_12 = arith.constant 0.000000e+00 : f32
    %14 = vector.broadcast %cst_12 : f32 to vector<32x256xf32>
    %15 = arith.maximumf %13, %14 : vector<32x256xf32>
    %c0_13 = arith.constant 0 : index
    %c0_14 = arith.constant 0 : index
    %16 = vector.load %arg7[%c0_13, %c0_14] : memref<32x1xf32, #tpu.memory_space<vmem>>, vector<32x1xf32>
    %17 = vector.broadcast %16 : vector<32x1xf32> to vector<32x256xf32>
    %18 = arith.mulf %15, %17 : vector<32x256xf32>
    %cst_15 = arith.constant dense<0.000000e+00> : vector<256xf32>
    %19 = vector.multi_reduction <add>, %18, %cst_15 [0] : vector<32x256xf32> to vector<256xf32>
    %20 = vector.shape_cast %19 : vector<256xf32> to vector<1x256xf32>
    %c0_16 = arith.constant 0 : index
    %c0_17 = arith.constant 0 : index
    %21 = vector.load %arg8[%c0_16, %c0_17] : memref<1x1xf32, #tpu.memory_space<vmem>>, vector<1x1xf32>
    %22 = vector.broadcast %21 : vector<1x1xf32> to vector<1x256xf32>
    %23 = arith.addf %20, %22 : vector<1x256xf32>
    %c0_18 = arith.constant 0 : index
    %c0_19 = arith.constant 0 : index
    %c0_20 = arith.constant 0 : index
    %24 = vector.load %arg9[%c0_18, %c0_19, %c0_20] : memref<1x1x256xf32, #tpu.memory_space<vmem>>, vector<1x1x256xf32>
    %25 = vector.shape_cast %24 : vector<1x1x256xf32> to vector<1x256xf32>
    %26 = vector.shape_cast %23 : vector<1x256xf32> to vector<1x1x256xf32>
    tpu.vector_store %arg9[%c0_18, %c0_19, %c0_20], %26 {strides = array<i32>} : memref<1x1x256xf32, #tpu.memory_space<vmem>>, vector<1x1x256xf32>,
    return
  }
  func.func @transform_0(%arg0: i32, %arg1: i32) -> (i32, i32, i32) {
    %c0_i32 = arith.constant 0 : i32
    %c0_i32_0 = arith.constant 0 : i32
    return %arg0, %c0_i32, %arg1 : i32, i32, i32
  }
  func.func @transform_1(%arg0: i32, %arg1: i32) -> (i32, i32) {
    %c0_i32 = arith.constant 0 : i32
    %c0_i32_0 = arith.constant 0 : i32
    %c0_i32_1 = arith.constant 0 : i32
    return %c0_i32, %c0_i32_0 : i32, i32
  }
  func.func @transform_2(%arg0: i32, %arg1: i32) -> (i32, i32) {
    %c0_i32 = arith.constant 0 : i32
    %c0_i32_0 = arith.constant 0 : i32
    %c0_i32_1 = arith.constant 0 : i32
    return %c0_i32, %c0_i32_0 : i32, i32
  }
  func.func @transform_3(%arg0: i32, %arg1: i32) -> (i32, i32) {
    %c0_i32 = arith.constant 0 : i32
    %c0_i32_0 = arith.constant 0 : i32
    %c0_i32_1 = arith.constant 0 : i32
    return %c0_i32, %c0_i32_0 : i32, i32
  }
  func.func @transform_4(%arg0: i32, %arg1: i32) -> (i32, i32) {
    %c0_i32 = arith.constant 0 : i32
    %c0_i32_0 = arith.constant 0 : i32
    %c0_i32_1 = arith.constant 0 : i32
    return %c0_i32, %c0_i32_0 : i32, i32
  }
  func.func @transform_5(%arg0: i32, %arg1: i32) -> (i32, i32) {
    %c0_i32 = arith.constant 0 : i32
    %c0_i32_0 = arith.constant 0 : i32
    %c0_i32_1 = arith.constant 0 : i32
    return %c0_i32, %c0_i32_0 : i32, i32
  }
  func.func @transform_6(%arg0: i32, %arg1: i32) -> (i32, i32) {
    %c0_i32 = arith.constant 0 : i32
    %c0_i32_0 = arith.constant 0 : i32
    %c0_i32_1 = arith.constant 0 : i32
    return %c0_i32, %c0_i32_0 : i32, i32
  }
  func.func @transform_7(%arg0: i32, %arg1: i32) -> (i32, i32, i32) {
    %c0_i32 = arith.constant 0 : i32
    %c0_i32_0 = arith.constant 0 : i32
    return %arg0, %c0_i32, %arg1 : i32, i32, i32
  }
}

</mosaic_0001>

<bundles_post_ra>
// kernel: datasetdm_forward.1
= control target key start
LH: loop header
LB: loop body
LE: loop exit
PB: predicated region body
PF: predicated region fallthrough
CT: control target
= control target key end

     0   :  { %s2976_s26 = smov 0   ;;  %s2978_s27 = smov 0   ;;  %s3654_s0 = inlined_call_operand.vmem [shape: bf16[2,960,256], index: 0, kind: input, shape index: {}]   ;;  %s3655_s1 = inlined_call_operand.vmem [shape: bf16[128,960], index: 1, kind: input, shape index: {}]   ;;  %s3656_s2 = inlined_call_operand.vmem [shape: f32[128,1], index: 2, kind: input, shape index: {}]   ;;  %s3657_s3 = inlined_call_operand.vmem [shape: f32[32,128], index: 3, kind: input, shape index: {}]   ;;  %s3658_s4 = inlined_call_operand.vmem [shape: f32[32,1], index: 4, kind: input, shape index: {}]   ;;  %s3659_s5 = inlined_call_operand.vmem [shape: f32[32,1], index: 5, kind: input, shape index: {}]   ;;  %s3660_s6 = inlined_call_operand.<no memory space> [shape: f32[1,1], index: 6, kind: input, shape index: {}]   ;;  %s3661_s7 = inlined_call_operand.vmem [shape: f32[2,1,256], index: 7, kind: output, shape index: {}]  }
   0x1   :  { %v12_v0 = vstv %s3660_s6  ;;  %s2980_s28 = smov 0  }
   0x2   :  { %13 = vst [vmem:[#allocation2] sm:$0x1] %v12_v0 }
   0x3 LB: > { %s31_s6 = sadd.s32 1, %s2924_s27  ;;  %p2315_p0 = scmp.ge.s32.totalorder %s2928_s28, 1  ;;  %s2928_s28 = sphi %s2980_s28, %s19_s28   ;;  %s2924_s27 = sphi %s2978_s27, %s3663_s27   ;;  %s2920_s26 = sphi %s2976_s26, %s3662_s26  }
   0x4   : > { %p33_p1 = scmp.ge.s32.totalorder %s31_s6, 2  ;;  %p260_p2 = scmp.lt.s32.totalorder %s2928_s28, 3 }
   0x6   : > { %s3665_s6 = smov (%p33_p1, %s31_s6), 0  ;;  %p261_p3 = pnand %p2315_p0, %p260_p2 }
   0x7   : > { %p300_p4 = scmp.lt.s32.totalorder (!%p261_p3), %s2920_s26, 1  ;;  %v2997_v1 = vld [vmem:[%s3655_s1 + $0x8] sm:$0xff] (!%p261_p3)  ;;  %v3011_v5 = vld [vmem:[%s3655_s1] sm:$0xff] (!%p261_p3)  ;;  %vm1511_vm0 = vcmask (!%p261_p3), 523264  }
   0x8   : > { %264 = sbr.rel (%p261_p3) target bundleno = 719 (0x2cf), region = 48  ;;  %v3002_v2 = vld [vmem:[%s3655_s1 + $0x28] sm:$0xff] (!%p261_p3)  ;;  %v3016_v6 = vld [vmem:[%s3655_s1 + $0x20] sm:$0xff] (!%p261_p3) }
   0x9   : > { %v2320_v3 = vcombine.low (!%p261_p3), %v2997_v1, %v3002_v2  ;;  %v2321_v4 = vcombine.high (!%p261_p3), %v2997_v1, %v3002_v2  ;;  %v2318_v7 = vcombine.low (!%p261_p3), %v3011_v5, %v3016_v6  ;;  %v2319_v8 = vcombine.high (!%p261_p3), %v3011_v5, %v3016_v6 }
   0xb   : > { %1681 = vmatprep.mubr.bf16.mxu0 (!%p261_p3), %v2321_v4  ;;  %1568 = vmatprep.mubr.bf16.mxu1 (!%p261_p3), %v2319_v8 }
   0xf   : > { %s3667_s26 = smov (!%p300_p4, %s2920_s26), 1 }
  0x10   : > { %s2696_s14 = smul.u32 960, %s3667_s26  ;;  %s2317_s19 = sshll.u32 %s3667_s26, 1 }
  0x11   : > { %s316_s22 = scalar_lea.vmem %s3661_s7, %s2317_s19 }
  0x12   : > { %s3028_s17 = scalar_lea.vmem %s3654_s0, %s2696_s14 }
  0x13   : > { %v2726_v9 = vld [vmem:[%s3028_s17 + $0x104] ss:$8 sps:$4 sm:$0xff]   ;;  %v2728_v10 = vld [vmem:[%s3028_s17 + $0x100] ss:$8 sps:$4 sm:$0xff]   ;;  %v2729_v11 = vld [vmem:[%s3028_s17 + $0x114] ss:$8 sps:$4 sm:$0xff]  }
  0x14   : > { %1649 = vmatprep.subr.bf16.mxu0 %v2726_v9  ;;  %v2731_v12 = vld [vmem:[%s3028_s17 + $0x110] ss:$8 sps:$4 sm:$0xff]   ;;  %v2732_v13 = vld [vmem:[%s3028_s17 + $0x124] ss:$8 sps:$4 sm:$0xff]   ;;  %v2737_v15 = vld [vmem:[%s3028_s17] ss:$8 sps:$4 sm:$0xff]  }
  0x15   : > { %1650 = vmatpush1.bf16.msra.mxu0 %v2728_v10  ;;  %v2735_v14 = vld [vmem:[%s3028_s17 + $0x4] ss:$8 sps:$4 sm:$0xff]   ;;  %v2734_v16 = vld [vmem:[%s3028_s17 + $0x120] ss:$8 sps:$4 sm:$0xff]   ;;  %v2741_v17 = vld [vmem:[%s3028_s17 + $0x14] ss:$8 sps:$4 sm:$0xff]  }
  0x16   : > { %1651 = vmatprep.subr.bf16.mxu0 %v2729_v11  ;;  %1536 = vmatprep.subr.bf16.mxu1 %v2735_v14  ;;  %v2743_v18 = vld [vmem:[%s3028_s17 + $0x10] ss:$8 sps:$4 sm:$0xff]   ;;  %v2738_v19 = vld [vmem:[%s3028_s17 + $0x134] ss:$8 sps:$4 sm:$0xff]   ;;  %v2747_v21 = vld [vmem:[%s3028_s17 + $0x24] ss:$8 sps:$4 sm:$0xff]  }
  0x17   : > { %1537 = vmatpush1.bf16.msra.mxu1 %v2737_v15  ;;  %v2740_v20 = vld [vmem:[%s3028_s17 + $0x130] ss:$8 sps:$4 sm:$0xff]   ;;  %v2744_v22 = vld [vmem:[%s3028_s17 + $0x144] ss:$8 sps:$4 sm:$0xff]   ;;  %v2749_v23 = vld [vmem:[%s3028_s17 + $0x20] ss:$8 sps:$4 sm:$0xff]  }
  0x18   : > { %1538 = vmatprep.subr.bf16.mxu1 %v2741_v17  ;;  %v2753_v24 = vld [vmem:[%s3028_s17 + $0x34] ss:$8 sps:$4 sm:$0xff]   ;;  %v2746_v25 = vld [vmem:[%s3028_s17 + $0x140] ss:$8 sps:$4 sm:$0xff]   ;;  %v2755_v27 = vld [vmem:[%s3028_s17 + $0x30] ss:$8 sps:$4 sm:$0xff]  }
  0x19   : > { %1652 = vmatpush1.bf16.msra.mxu0 %v2731_v12  ;;  %v2750_v26 = vld [vmem:[%s3028_s17 + $0x154] ss:$8 sps:$4 sm:$0xff]   ;;  %v2759_v28 = vld [vmem:[%s3028_s17 + $0x44] ss:$8 sps:$4 sm:$0xff]   ;;  %v2752_v29 = vld [vmem:[%s3028_s17 + $0x150] ss:$8 sps:$4 sm:$0xff]  }
  0x1a   : > { %1653 = vmatprep.subr.bf16.mxu0 %v2732_v13  ;;  %v2756_v30 = vld [vmem:[%s3028_s17 + $0x164] ss:$8 sps:$4 sm:$0xff]   ;;  %v2761_v31 = vld [vmem:[%s3028_s17 + $0x40] ss:$8 sps:$4 sm:$0xff]   ;;  %v2765_v32 = vld [vmem:[%s3028_s17 + $0x54] ss:$8 sps:$4 sm:$0xff]  }
  0x1b   : > { %1539 = vmatpush1.bf16.msra.mxu1 %v2743_v18  ;;  %v2758_v33 = vld [vmem:[%s3028_s17 + $0x160] ss:$8 sps:$4 sm:$0xff]   ;;  %v2762_v34 = vld [vmem:[%s3028_s17 + $0x174] ss:$8 sps:$4 sm:$0xff]   ;;  %v2767_v35 = vld [vmem:[%s3028_s17 + $0x50] ss:$8 sps:$4 sm:$0xff]  }
  0x1c   : > { %1540 = vmatprep.subr.bf16.mxu1 %v2747_v21  ;;  %v2771_v36 = vld [vmem:[%s3028_s17 + $0x64] ss:$8 sps:$4 sm:$0xff]   ;;  %v2764_v37 = vld [vmem:[%s3028_s17 + $0x170] ss:$8 sps:$4 sm:$0xff]   ;;  %v2773_v39 = vld [vmem:[%s3028_s17 + $0x60] ss:$8 sps:$4 sm:$0xff]  }
  0x1d   : > { %1654 = vmatpush1.bf16.msra.mxu0 %v2734_v16  ;;  %v2768_v38 = vld [vmem:[%s3028_s17 + $0x184] ss:$8 sps:$4 sm:$0xff]   ;;  %v2777_v40 = vld [vmem:[%s3028_s17 + $0x74] ss:$8 sps:$4 sm:$0xff]   ;;  %v2770_v41 = vld [vmem:[%s3028_s17 + $0x180] ss:$8 sps:$4 sm:$0xff]  }
  0x1e   : > { %1655 = vmatprep.subr.bf16.mxu0 %v2738_v19  ;;  %v2774_v42 = vld [vmem:[%s3028_s17 + $0x194] ss:$8 sps:$4 sm:$0xff]   ;;  %v2779_v43 = vld [vmem:[%s3028_s17 + $0x70] ss:$8 sps:$4 sm:$0xff]   ;;  %v2783_v44 = vld [vmem:[%s3028_s17 + $0x84] ss:$8 sps:$4 sm:$0xff]  }
  0x1f   : > { %1541 = vmatpush1.bf16.msra.mxu1 %v2749_v23  ;;  %v2776_v45 = vld [vmem:[%s3028_s17 + $0x190] ss:$8 sps:$4 sm:$0xff]   ;;  %v2780_v46 = vld [vmem:[%s3028_s17 + $0x1a4] ss:$8 sps:$4 sm:$0xff]   ;;  %v2785_v47 = vld [vmem:[%s3028_s17 + $0x80] ss:$8 sps:$4 sm:$0xff]  }
  0x20   : > { %1542 = vmatprep.subr.bf16.mxu1 %v2753_v24  ;;  %v2789_v48 = vld [vmem:[%s3028_s17 + $0x94] ss:$8 sps:$4 sm:$0xff]   ;;  %v2782_v49 = vld [vmem:[%s3028_s17 + $0x1a0] ss:$8 sps:$4 sm:$0xff]   ;;  %v2791_v51 = vld [vmem:[%s3028_s17 + $0x90] ss:$8 sps:$4 sm:$0xff]  }
  0x21   : > { %1656 = vmatpush1.bf16.msra.mxu0 %v2740_v20  ;;  %v2786_v50 = vld [vmem:[%s3028_s17 + $0x1b4] ss:$8 sps:$4 sm:$0xff]   ;;  %v2795_v52 = vld [vmem:[%s3028_s17 + $0xa4] ss:$8 sps:$4 sm:$0xff]   ;;  %v2788_v53 = vld [vmem:[%s3028_s17 + $0x1b0] ss:$8 sps:$4 sm:$0xff]  }
  0x22   : > { %1657 = vmatprep.subr.bf16.mxu0 %v2744_v22  ;;  %v2792_v54 = vld [vmem:[%s3028_s17 + $0x1c4] ss:$8 sps:$4 sm:$0xff]   ;;  %v2797_v55 = vld [vmem:[%s3028_s17 + $0xa0] ss:$8 sps:$4 sm:$0xff]   ;;  %v2801_v56 = vld [vmem:[%s3028_s17 + $0xb4] ss:$8 sps:$4 sm:$0xff]  }
  0x23   : > { %1543 = vmatpush1.bf16.msra.mxu1 %v2755_v27  ;;  %v2794_v57 = vld [vmem:[%s3028_s17 + $0x1c0] ss:$8 sps:$4 sm:$0xff]   ;;  %v2798_v58 = vld [vmem:[%s3028_s17 + $0x1d4] ss:$8 sps:$4 sm:$0xff]   ;;  %v2803_v59 = vld [vmem:[%s3028_s17 + $0xb0] ss:$8 sps:$4 sm:$0xff]  }
  0x24   : > { %1544 = vmatprep.subr.bf16.mxu1 %v2759_v28  ;;  %v2807_v60 = vld [vmem:[%s3028_s17 + $0xc4] ss:$8 sps:$4 sm:$0xff]   ;;  %v2800_v61 = vld [vmem:[%s3028_s17 + $0x1d0] ss:$8 sps:$4 sm:$0xff]   ;;  %v2809_v63 = vld [vmem:[%s3028_s17 + $0xc0] ss:$8 sps:$4 sm:$0xff]  }
  0x25   : > { %1658 = vmatpush1.bf16.msra.mxu0 %v2746_v25  ;;  %v2804_v62 = vld [vmem:[%s3028_s17 + $0x1e4] ss:$8 sps:$4 sm:$0xff]   ;;  %v2813_v0 = vld [vmem:[%s3028_s17 + $0xd4] ss:$8 sps:$4 sm:$0xff]   ;;  %v2806_v4 = vld [vmem:[%s3028_s17 + $0x1e0] ss:$8 sps:$4 sm:$0xff]  }
  0x26   : > { %1659 = vmatprep.subr.bf16.mxu0 %v2750_v26  ;;  %v2810_v8 = vld [vmem:[%s3028_s17 + $0x1f4] ss:$8 sps:$4 sm:$0xff]   ;;  %v2815_v9 = vld [vmem:[%s3028_s17 + $0xd0] ss:$8 sps:$4 sm:$0xff]   ;;  %v2819_v10 = vld [vmem:[%s3028_s17 + $0xe4] ss:$8 sps:$4 sm:$0xff]  }
  0x27   : > { %1545 = vmatpush1.bf16.msra.mxu1 %v2761_v31  ;;  %v2812_v11 = vld [vmem:[%s3028_s17 + $0x1f0] ss:$8 sps:$4 sm:$0xff]   ;;  %v2818_v12 = vld [vmem:[%s3028_s17 + $0x204] ss:$8 sps:$4 sm:$0xff]   ;;  %v2821_v13 = vld [vmem:[%s3028_s17 + $0xe0] ss:$8 sps:$4 sm:$0xff]  }
  0x28   : > { %1546 = vmatprep.subr.bf16.mxu1 %v2765_v32  ;;  %v448_v14 = vld [vmem:[%s3655_s1 + $0x48] sm:$0xff]  ;;  %v2825_v15 = vld [vmem:[%s3028_s17 + $0xf4] ss:$8 sps:$4 sm:$0xff]   ;;  %v2930_v17 = vmov 0   ;;  %v447_v19 = vld [vmem:[%s3655_s1 + $0x40] sm:$0xff] }
  0x29   : > { %1660 = vmatpush1.bf16.msra.mxu0 %v2752_v29  ;;  %v452_v16 = vld [vmem:[%s3655_s1 + $0x68] sm:$0xff]  ;;  %2724 = vset.pattern.permute.xlu0 %v2930_v17  ;;  %v451_v20 = vld [vmem:[%s3655_s1 + $0x60] sm:$0xff]  ;;  %v2827_v21 = vld [vmem:[%s3028_s17 + $0xf0] ss:$8 sps:$4 sm:$0xff]  }
  0x2a   : > { %1661 = vmatprep.subr.bf16.mxu0 %v2756_v30  ;;  %2725 = vset.pattern.permute.xlu1 %v2930_v17  ;;  %v2816_v18 = vld [vmem:[%s3028_s17 + $0x200] ss:$8 sps:$4 sm:$0xff]   ;;  %v2824_v22 = vld [vmem:[%s3028_s17 + $0x214] ss:$8 sps:$4 sm:$0xff]   ;;  %v2329_v23 = vcombine.high %v448_v14, %v452_v16  ;;  %v3110_v24 = vld [vmem:[%s3028_s17 + $0x304] ss:$8 sps:$4 sm:$0xff]   ;;  %v2327_v28 = vcombine.high %v447_v19, %v451_v20  ;;  %v2328_v2 = vcombine.low %v448_v14, %v452_v16 }
  0x2b   : > { %1547 = vmatpush1.bf16.msra.mxu1 %v2767_v35  ;;  %v456_v25 = vld [vmem:[%s3655_s1 + $0x88] sm:$0xff]  ;;  %v2822_v26 = vld [vmem:[%s3028_s17 + $0x210] ss:$8 sps:$4 sm:$0xff]   ;;  %v3128_v1 = vld [vmem:[%s3028_s17 + $0x314] ss:$8 sps:$4 sm:$0xff]  }
  0x2c   : > { %1548 = vmatprep.subr.bf16.mxu1 %v2771_v36  ;;  %v460_v27 = vld [vmem:[%s3655_s1 + $0xa8] sm:$0xff]  ;;  %v455_v31 = vld [vmem:[%s3655_s1 + $0x80] sm:$0xff]  ;;  %v3143_v5 = vld [vmem:[%s3028_s17 + $0x310] ss:$8 sps:$4 sm:$0xff]  }
  0x2d   : > { %1662 = vmatpush1.bf16.msra.mxu0 %v2758_v33  ;;  %v2830_v29 = vld [vmem:[%s3028_s17 + $0x224] ss:$8 sps:$4 sm:$0xff]   ;;  %v3124_v30 = vld [vmem:[%s3028_s17 + $0x300] ss:$8 sps:$4 sm:$0xff]   ;;  %v2833_v33 = vld [vmem:[%s3028_s17 + $0x234] ss:$8 sps:$4 sm:$0xff]  }
  0x2e   : > { %1663 = vmatprep.subr.bf16.mxu0 %v2762_v34  ;;  %v459_v32 = vld [vmem:[%s3655_s1 + $0xa0] sm:$0xff]  ;;  %v2337_v34 = vcombine.high %v456_v25, %v460_v27  ;;  %v464_v35 = vld [vmem:[%s3655_s1 + $0xc8] sm:$0xff]  ;;  %v2831_v36 = vld [vmem:[%s3028_s17 + $0x230] ss:$8 sps:$4 sm:$0xff]  }
  0x2f   : > { %1549 = vmatpush1.bf16.msra.mxu1 %v2773_v39  ;;  %v3147_v6 = vld [vmem:[%s3028_s17 + $0x324] ss:$8 sps:$4 sm:$0xff]   ;;  %v2335_v39 = vcombine.high %v455_v31, %v459_v32  ;;  %v3223_v14 = vld [vmem:[%s3028_s17 + $0x360] ss:$8 sps:$4 sm:$0xff]  }
  0x30   : > { %1550 = vmatprep.subr.bf16.mxu1 %v2777_v40  ;;  %v3159_v40 = vld [vmem:[%s3028_s17 + $0x320] ss:$8 sps:$4 sm:$0xff]  }
  0x31   : > { %1664 = vmatpush1.bf16.msra.mxu0 %v2764_v37  ;;  %v2836_v37 = vld [vmem:[%s3028_s17 + $0x244] ss:$8 sps:$4 sm:$0xff]  }
  0x32   : > { %1665 = vmatprep.subr.bf16.mxu0 %v2768_v38  ;;  %v468_v38 = vld [vmem:[%s3655_s1 + $0xe8] sm:$0xff]  ;;  %v503_v17 = vld [vmem:[%s3656_s2] sm:$0xff] }
  0x33   : > { %1551 = vmatpush1.bf16.msra.mxu1 %v2779_v43  ;;  %v463_v43 = vld [vmem:[%s3655_s1 + $0xc0] sm:$0xff]  ;;  %521 = vperm.xlu0 %2724, %v503_v17   ;;  %v513_v17 = vld [vmem:[%s3656_s2 + $0x50] sm:$0xff] }
  0x34   : > { %1552 = vmatprep.subr.bf16.mxu1 %v2783_v44  ;;  %v2834_v44 = vld [vmem:[%s3028_s17 + $0x240] ss:$8 sps:$4 sm:$0xff]  }
  0x35   : > { %1666 = vmatpush1.bf16.msra.mxu0 %v2770_v41  ;;  %v3163_v41 = vld [vmem:[%s3028_s17 + $0x334] ss:$8 sps:$4 sm:$0xff]  }
  0x36   : > { %1667 = vmatprep.subr.bf16.mxu0 %v2774_v42  ;;  %v2336_v42 = vcombine.low %v456_v25, %v460_v27  ;;  %v3245_v25 = vld [vmem:[%s3028_s17 + $0x370] ss:$8 sps:$4 sm:$0xff]  }
  0x37   : > { %1553 = vmatpush1.bf16.msra.mxu1 %v2785_v47  ;;  %v467_v47 = vld [vmem:[%s3655_s1 + $0xe0] sm:$0xff] }
  0x38   : > { %1554 = vmatprep.subr.bf16.mxu1 %v2789_v48  ;;  %v3175_v48 = vld [vmem:[%s3028_s17 + $0x330] ss:$8 sps:$4 sm:$0xff]  }
  0x39   : > { %1668 = vmatpush1.bf16.msra.mxu0 %v2776_v45  ;;  %v2345_v45 = vcombine.high %v464_v35, %v468_v38 }
  0x3a   : > { %1669 = vmatprep.subr.bf16.mxu0 %v2780_v46  ;;  %v2839_v46 = vld [vmem:[%s3028_s17 + $0x254] ss:$8 sps:$4 sm:$0xff]  }
  0x3b   : > { %1555 = vmatpush1.bf16.msra.mxu1 %v2791_v51  ;;  %v472_v51 = vld [vmem:[%s3655_s1 + $0x108] sm:$0xff] }
  0x3c   : > { %1556 = vmatprep.subr.bf16.mxu1 %v2795_v52  ;;  %v2837_v52 = vld [vmem:[%s3028_s17 + $0x250] ss:$8 sps:$4 sm:$0xff]  }
  0x3d   : > { %1670 = vmatpush1.bf16.msra.mxu0 %v2782_v49  ;;  %v3179_v49 = vld [vmem:[%s3028_s17 + $0x344] ss:$8 sps:$4 sm:$0xff]  }
  0x3e   : > { %1671 = vmatprep.subr.bf16.mxu0 %v2786_v50  ;;  %v2334_v50 = vcombine.low %v455_v31, %v459_v32  ;;  %v506_v31 = vld [vmem:[%s3656_s2 + $0x18] sm:$0xff]  ;;  %v488_v32 = vld [vmem:[%s3655_s1 + $0x188] sm:$0xff] }
  0x3f   : > { %1557 = vmatpush1.bf16.msra.mxu1 %v2797_v55  ;;  %v476_v55 = vld [vmem:[%s3655_s1 + $0x128] sm:$0xff] }
  0x40   : > { %1558 = vmatprep.subr.bf16.mxu1 %v2801_v56  ;;  %v3191_v56 = vld [vmem:[%s3028_s17 + $0x340] ss:$8 sps:$4 sm:$0xff]   ;;  %v2352_v16 = vcombine.low %v472_v51, %v476_v55 }
  0x41   : > { %1672 = vmatpush1.bf16.msra.mxu0 %v2788_v53  ;;  %v2343_v53 = vcombine.high %v463_v43, %v467_v47 }
  0x42   : > { %1673 = vmatprep.subr.bf16.mxu0 %v2792_v54  ;;  %v2842_v54 = vld [vmem:[%s3028_s17 + $0x264] ss:$8 sps:$4 sm:$0xff]  }
  0x43   : > { %1559 = vmatpush1.bf16.msra.mxu1 %v2803_v59  ;;  %v2840_v59 = vld [vmem:[%s3028_s17 + $0x260] ss:$8 sps:$4 sm:$0xff]  }
  0x44   : > { %1560 = vmatprep.subr.bf16.mxu1 %v2807_v60  ;;  %v2353_v60 = vcombine.high %v472_v51, %v476_v55  ;;  %v2870_v51 = vld [vmem:[%s3028_s17 + $0x2b0] ss:$8 sps:$4 sm:$0xff]   ;;  %v496_v55 = vld [vmem:[%s3655_s1 + $0x1c8] sm:$0xff] }
  0x45   : > { %1674 = vmatpush1.bf16.msra.mxu0 %v2794_v57  ;;  %v3195_v57 = vld [vmem:[%s3028_s17 + $0x354] ss:$8 sps:$4 sm:$0xff]  }
  0x46   : > { %1675 = vmatprep.subr.bf16.mxu0 %v2798_v58  ;;  %v2344_v58 = vcombine.low %v464_v35, %v468_v38  ;;  %v2872_v38 = vld [vmem:[%s3028_s17 + $0x2b4] ss:$8 sps:$4 sm:$0xff]  }
  0x47   : > { %1561 = vmatpush1.bf16.msra.mxu1 %v2809_v63  ;;  %v475_v63 = vld [vmem:[%s3655_s1 + $0x120] sm:$0xff] }
  0x48   : > { %1562 = vmatprep.subr.bf16.mxu1 %v2813_v0  ;;  %v3207_v0 = vld [vmem:[%s3028_s17 + $0x350] ss:$8 sps:$4 sm:$0xff]  }
  0x49   : > { %1676 = vmatpush1.bf16.msra.mxu0 %v2800_v61  ;;  %v471_v61 = vld [vmem:[%s3655_s1 + $0x100] sm:$0xff] }
  0x4a   : > { %1677 = vmatprep.subr.bf16.mxu0 %v2804_v62  ;;  %v2848_v62 = vld [vmem:[%s3028_s17 + $0x274] ss:$8 sps:$4 sm:$0xff]   ;;  %v2350_v27 = vcombine.low %v471_v61, %v475_v63 }
  0x4b   : > { %1563 = vmatpush1.bf16.msra.mxu1 %v2815_v9  ;;  %v2846_v9 = vld [vmem:[%s3028_s17 + $0x270] ss:$8 sps:$4 sm:$0xff]  }
  0x4c   : > { %1564 = vmatprep.subr.bf16.mxu1 %v2819_v10  ;;  %v480_v10 = vld [vmem:[%s3655_s1 + $0x148] sm:$0xff] }
  0x4d   : > { %1678 = vmatpush1.bf16.msra.mxu0 %v2806_v4  ;;  %v3211_v4 = vld [vmem:[%s3028_s17 + $0x364] ss:$8 sps:$4 sm:$0xff]  }
  0x4e   : > { %1679 = vmatprep.subr.bf16.mxu0 %v2810_v8  ;;  %v2342_v8 = vcombine.low %v463_v43, %v467_v47  ;;  %v487_v43 = vld [vmem:[%s3655_s1 + $0x180] sm:$0xff] }
  0x4f   : > { %1565 = vmatpush1.bf16.msra.mxu1 %v2821_v13  ;;  %v484_v13 = vld [vmem:[%s3655_s1 + $0x168] sm:$0xff] }
  0x50   : > { %1566 = vmatprep.subr.bf16.mxu1 %v2825_v15  ;;  %v3227_v15 = vld [vmem:[%s3028_s17 + $0x374] ss:$8 sps:$4 sm:$0xff]   ;;  %v2360_v35 = vcombine.low %v480_v10, %v484_v13 }
  0x51   : > { %1680 = vmatpush1.bf16.msra.mxu0 %v2812_v11  ;;  %v2351_v11 = vcombine.high %v471_v61, %v475_v63  ;;  %v2876_v63 = vld [vmem:[%s3028_s17 + $0x2c0] ss:$8 sps:$4 sm:$0xff]  }
  0x52   : > { %1762 = vmatprep.subr.bf16.mxu0 %v2818_v12  ;;  %v2854_v12 = vld [vmem:[%s3028_s17 + $0x284] ss:$8 sps:$4 sm:$0xff]  }
  0x53   : > { %1567 = vmatpush1.bf16.msra.mxu1 %v2827_v21  ;;  %v505_v21 = vld [vmem:[%s3656_s2 + $0x10] sm:$0xff] }
  0x54   : > { %1682 = vmatmul.mubr.bf16.vlgmr.msra.gmra.mrb[0].mxu0 %v2320_v3  ;;  %2544 = vmatprep.subr.bf16.mxu1 %v3110_v24  ;;  %v2828_v3 = vld [vmem:[%s3028_s17 + $0x220] ss:$8 sps:$4 sm:$0xff]  }
  0x55   : > { %1763 = vmatpush1.bf16.msra.mxu0 %v2816_v18  ;;  %1691 = vmatprep.mubr.bf16.mxu0 %v2329_v23  ;;  %v2852_v18 = vld [vmem:[%s3028_s17 + $0x280] ss:$8 sps:$4 sm:$0xff]  }
  0x56   : > { %1764 = vmatprep.subr.bf16.mxu0 %v2824_v22  ;;  %1569 = vmatmul.mubr.bf16.vlgmr.msra.gmra.mrb[0].mxu1 %v2318_v7  ;;  %v2326_v7 = vcombine.low %v447_v19, %v451_v20  ;;  %v2860_v19 = vld [vmem:[%s3028_s17 + $0x294] ss:$8 sps:$4 sm:$0xff]   ;;  %v2361_v20 = vcombine.high %v480_v10, %v484_v13  ;;  %v479_v22 = vld [vmem:[%s3655_s1 + $0x140] sm:$0xff]  ;;  %v512_v10 = vld [vmem:[%s3656_s2 + $0x48] sm:$0xff] }
  0x57   : > { %1578 = vmatprep.mubr.bf16.mxu1 %v2327_v28  ;;  %2556 = vmatpush1.bf16.msra.mxu1 %v3124_v30  ;;  %v483_v23 = vld [vmem:[%s3655_s1 + $0x160] sm:$0xff]  ;;  %v504_v28 = vld [vmem:[%s3656_s2 + $0x8] sm:$0xff]  ;;  %v3333_v13 = vld [vmem:[%s3028_s17 + $0x3b0] ss:$8 sps:$4 sm:$0xff]  }
  0x58   : > { %2545 = vmatprep.subr.bf16.mxu1 %v3128_v1  ;;  %531 = vperm.xlu1 %2725, %v505_v21   ;;  %v2358_v47 = vcombine.low %v479_v22, %v483_v23  ;;  %v2890_v21 = vld [vmem:[%s3028_s17 + $0x2e4] ss:$8 sps:$4 sm:$0xff]  }
  0x59   : > { %1765 = vmatpush1.bf16.msra.mxu0 %v2822_v26  ;;  %v3249_v26 = vld [vmem:[%s3028_s17 + $0x384] ss:$8 sps:$4 sm:$0xff]   ;;  %526 = vperm.xlu0 %2724, %v504_v28  }
  0x5a   : > { %1766 = vmatprep.subr.bf16.mxu0 %v2830_v29  ;;  %v2858_v29 = vld [vmem:[%s3028_s17 + $0x290] ss:$8 sps:$4 sm:$0xff]   ;;  %v515_v28 = vld [vmem:[%s3656_s2 + $0x60] sm:$0xff] }
  0x5b   : > { %2557 = vmatpush1.bf16.msra.mxu1 %v3143_v5 }
  0x5c   : > { %1692 = vmatmul.mubr.bf16.gmra.mrb[4].mxu0 %v2328_v2  ;;  %2546 = vmatprep.subr.bf16.mxu1 %v3147_v6  ;;  %v2866_v2 = vld [vmem:[%s3028_s17 + $0x2a4] ss:$8 sps:$4 sm:$0xff]  }
  0x5d   : > { %1767 = vmatpush1.bf16.msra.mxu0 %v2828_v3  ;;  %1701 = vmatprep.mubr.bf16.mxu0 %v2337_v34  ;;  %v2359_v3 = vcombine.high %v479_v22, %v483_v23  ;;  %v3267_v34 = vld [vmem:[%s3028_s17 + $0x380] ss:$8 sps:$4 sm:$0xff]   ;;  %v441_v22 = vld [vmem:[%s3655_s1 + $0x10] sm:$0xff] }
  0x5e   : > { %1768 = vmatprep.subr.bf16.mxu0 %v2833_v33  ;;  %1579 = vmatmul.mubr.bf16.gmra.mrb[4].mxu1 %v2326_v7  ;;  %v492_v33 = vld [vmem:[%s3655_s1 + $0x1a8] sm:$0xff]  ;;  %v3271_v7 = vld [vmem:[%s3028_s17 + $0x394] ss:$8 sps:$4 sm:$0xff]  }
  0x5f   : > { %1588 = vmatprep.mubr.bf16.mxu1 %v2335_v39  ;;  %2558 = vmatpush1.bf16.msra.mxu1 %v3159_v40  ;;  %v2369_v39 = vcombine.high %v488_v32, %v492_v33  ;;  %v2368_v61 = vcombine.low %v488_v32, %v492_v33  ;;  %v445_v23 = vld [vmem:[%s3655_s1 + $0x30] sm:$0xff]  ;;  %v450_v32 = vld [vmem:[%s3655_s1 + $0x58] sm:$0xff] }
  0x60   : > { %2547 = vmatprep.subr.bf16.mxu1 %v3163_v41  ;;  %536 = vperm.xlu1 %2725, %v506_v31   ;;  %v2896_v31 = vld [vmem:[%s3028_s17 + $0x2f4] ss:$8 sps:$4 sm:$0xff]  }
  0x61   : > { %1769 = vmatpush1.bf16.msra.mxu0 %v2831_v36  ;;  %v507_v36 = vld [vmem:[%s3656_s2 + $0x20] sm:$0xff]  ;;  %v454_v33 = vld [vmem:[%s3655_s1 + $0x78] sm:$0xff] }
  0x62   : > { %1770 = vmatprep.subr.bf16.mxu0 %v2836_v37  ;;  %v2864_v37 = vld [vmem:[%s3028_s17 + $0x2a0] ss:$8 sps:$4 sm:$0xff]   ;;  %541 = vperm.xlu0 %2724, %v507_v36   ;;  %v517_v36 = vld [vmem:[%s3656_s2 + $0x70] sm:$0xff] }
  0x63   : > { %2559 = vmatpush1.bf16.msra.mxu1 %v3175_v48 }
  0x64   : > { %1702 = vmatmul.mubr.bf16.gmra.mrb[8].mxu0 %v2336_v42  ;;  %2548 = vmatprep.subr.bf16.mxu1 %v3179_v49  ;;  %v508_v42 = vld [vmem:[%s3656_s2 + $0x28] sm:$0xff] }
  0x65   : > { %1771 = vmatpush1.bf16.msra.mxu0 %v2834_v44  ;;  %1711 = vmatprep.mubr.bf16.mxu0 %v2345_v45  ;;  %v491_v44 = vld [vmem:[%s3655_s1 + $0x1a0] sm:$0xff]  ;;  %v3289_v45 = vld [vmem:[%s3028_s17 + $0x390] ss:$8 sps:$4 sm:$0xff]  }
  0x66   : > { %1772 = vmatprep.subr.bf16.mxu0 %v2839_v46  ;;  %1589 = vmatmul.mubr.bf16.gmra.mrb[8].mxu1 %v2334_v50  ;;  %v3293_v46 = vld [vmem:[%s3028_s17 + $0x3a4] ss:$8 sps:$4 sm:$0xff]   ;;  %v509_v50 = vld [vmem:[%s3656_s2 + $0x30] sm:$0xff] }
  0x67   : > { %1598 = vmatprep.mubr.bf16.mxu1 %v2343_v53  ;;  %2560 = vmatpush1.bf16.msra.mxu1 %v3191_v56  ;;  %v2367_v53 = vcombine.high %v487_v43, %v491_v44 }
  0x68   : > { %2549 = vmatprep.subr.bf16.mxu1 %v3195_v57  ;;  %546 = vperm.xlu1 %2725, %v508_v42   ;;  %v449_v42 = vld [vmem:[%s3655_s1 + $0x50] sm:$0xff] }
  0x69   : > { %1773 = vmatpush1.bf16.msra.mxu0 %v2837_v52  ;;  %v2878_v52 = vld [vmem:[%s3028_s17 + $0x2c4] ss:$8 sps:$4 sm:$0xff]   ;;  %551 = vperm.xlu0 %2724, %v509_v50  }
  0x6a   : > { %1774 = vmatprep.subr.bf16.mxu0 %v2842_v54  ;;  %v510_v54 = vld [vmem:[%s3656_s2 + $0x38] sm:$0xff] }
  0x6b   : > { %2561 = vmatpush1.bf16.msra.mxu1 %v3207_v0 }
  0x6c   : > { %1712 = vmatmul.mubr.bf16.gmra.mrb[12].mxu0 %v2344_v58  ;;  %2550 = vmatprep.subr.bf16.mxu1 %v3211_v4  ;;  %v500_v58 = vld [vmem:[%s3655_s1 + $0x1e8] sm:$0xff] }
  0x6d   : > { %1775 = vmatpush1.bf16.msra.mxu0 %v2840_v59  ;;  %1721 = vmatprep.mubr.bf16.mxu0 %v2353_v60  ;;  %v3311_v59 = vld [vmem:[%s3028_s17 + $0x3a0] ss:$8 sps:$4 sm:$0xff]   ;;  %v3315_v60 = vld [vmem:[%s3028_s17 + $0x3b4] ss:$8 sps:$4 sm:$0xff]  }
  0x6e   : > { %1776 = vmatprep.subr.bf16.mxu0 %v2848_v62  ;;  %1599 = vmatmul.mubr.bf16.gmra.mrb[12].mxu1 %v2342_v8  ;;  %v511_v62 = vld [vmem:[%s3656_s2 + $0x40] sm:$0xff]  ;;  %v2884_v8 = vld [vmem:[%s3028_s17 + $0x2d4] ss:$8 sps:$4 sm:$0xff]  }
  0x6f   : > { %1608 = vmatprep.mubr.bf16.mxu1 %v2351_v11  ;;  %2562 = vmatpush1.bf16.msra.mxu1 %v3223_v14  ;;  %v495_v11 = vld [vmem:[%s3655_s1 + $0x1c0] sm:$0xff] }
  0x70   : > { %2551 = vmatprep.subr.bf16.mxu1 %v3227_v15  ;;  %556 = vperm.xlu1 %2725, %v510_v54   ;;  %v2332_v54 = vcombine.low %v450_v32, %v454_v33 }
  0x71   : > { %1777 = vmatpush1.bf16.msra.mxu0 %v2846_v9  ;;  %v2377_v9 = vcombine.high %v496_v55, %v500_v58  ;;  %561 = vperm.xlu0 %2724, %v511_v62   ;;  %v461_v62 = vld [vmem:[%s3655_s1 + $0xb0] sm:$0xff] }
  0x72   : > { %1778 = vmatprep.subr.bf16.mxu0 %v2854_v12  ;;  %v499_v12 = vld [vmem:[%s3655_s1 + $0x1e0] sm:$0xff] }
  0x73   : > { %2563 = vmatpush1.bf16.msra.mxu1 %v3245_v25 }
  0x74   : > { %1722 = vmatmul.mubr.bf16.gmra.mrb[16].mxu0 %v2352_v16  ;;  %2552 = vmatprep.subr.bf16.mxu1 %v3249_v26  ;;  %v2366_v16 = vcombine.low %v487_v43, %v491_v44  ;;  %v453_v43 = vld [vmem:[%s3655_s1 + $0x70] sm:$0xff]  ;;  %v2322_v44 = vcombine.low %v441_v22, %v445_v23 }
  0x75   : > { %1779 = vmatpush1.bf16.msra.mxu0 %v2852_v18  ;;  %1731 = vmatprep.mubr.bf16.mxu0 %v2361_v20  ;;  %v2882_v18 = vld [vmem:[%s3028_s17 + $0x2d0] ss:$8 sps:$4 sm:$0xff]   ;;  %v2331_v50 = vcombine.high %v449_v42, %v453_v43 }
  0x76   : > { %1780 = vmatprep.subr.bf16.mxu0 %v2860_v19  ;;  %1609 = vmatmul.mubr.bf16.gmra.mrb[16].mxu1 %v2350_v27  ;;  %v2375_v19 = vcombine.high %v495_v11, %v499_v12  ;;  %v514_v20 = vld [vmem:[%s3656_s2 + $0x58] sm:$0xff]  ;;  %v2376_v27 = vcombine.low %v496_v55, %v500_v58  ;;  %v2026_v55 = vld [vmem:[%s3658_s4 + $0x10] sm:$0xff] }
  0x77   : > { %1618 = vmatprep.mubr.bf16.mxu1 %v2359_v3  ;;  %2564 = vmatpush1.bf16.msra.mxu1 %v3267_v34  ;;  %v516_v3 = vld [vmem:[%s3656_s2 + $0x68] sm:$0xff]  ;;  %v2027_v58 = vld [vmem:[%s3658_s4 + $0x18] sm:$0xff] }
  0x78   : > { %2553 = vmatprep.subr.bf16.mxu1 %v3271_v7  ;;  %566 = vperm.xlu1 %2725, %v512_v10   ;;  %v470_v10 = vld [vmem:[%s3655_s1 + $0xf8] sm:$0xff] }
  0x79   : > { %1781 = vmatpush1.bf16.msra.mxu0 %v2858_v29  ;;  %571 = vperm.xlu0 %2724, %v513_v17   ;;  %v2888_v29 = vld [vmem:[%s3028_s17 + $0x2e0] ss:$8 sps:$4 sm:$0xff]   ;;  %v469_v17 = vld [vmem:[%s3655_s1 + $0xf0] sm:$0xff] }
  0x7a   : > { %1782 = vmatprep.subr.bf16.mxu0 %v2866_v2  ;;  %v2323_v2 = vcombine.high %v441_v22, %v445_v23 }
  0x7b   : > { %2565 = vmatpush1.bf16.msra.mxu1 %v3289_v45 }
  0x7c   : > { %1732 = vmatmul.mubr.bf16.gmra.mrb[20].mxu0 %v2360_v35  ;;  %2554 = vmatprep.subr.bf16.mxu1 %v3293_v46  ;;  %v2374_v35 = vcombine.low %v495_v11, %v499_v12  ;;  %v2148_v12 = vld [vmem:[%s3659_s5 + $0x18] sm:$0xff] }
  0x7d   : > { %1783 = vmatpush1.bf16.msra.mxu0 %v2864_v37  ;;  %1741 = vmatprep.mubr.bf16.mxu0 %v2369_v39  ;;  %v2894_v37 = vld [vmem:[%s3028_s17 + $0x2f0] ss:$8 sps:$4 sm:$0xff]  }
  0x7e   : > { %1784 = vmatprep.subr.bf16.mxu0 %v2872_v38  ;;  %1619 = vmatmul.mubr.bf16.gmra.mrb[20].mxu1 %v2358_v47  ;;  %v2333_v38 = vcombine.high %v450_v32, %v454_v33  ;;  %v518_v39 = vld [vmem:[%s3656_s2 + $0x78] sm:$0xff]  ;;  %v2024_v47 = vld [vmem:[%s3658_s4] sm:$0xff] }
  0x7f   : > { %1628 = vmatprep.mubr.bf16.mxu1 %v2367_v53  ;;  %2566 = vmatpush1.bf16.msra.mxu1 %v3311_v59  ;;  %v462_v53 = vld [vmem:[%s3655_s1 + $0xb8] sm:$0xff] }
  0x80   : > { %2555 = vmatprep.subr.bf16.mxu1 %v3315_v60  ;;  %576 = vperm.xlu1 %2725, %v514_v20   ;;  %v474_v20 = vld [vmem:[%s3655_s1 + $0x118] sm:$0xff] }
  0x81   : > { %1785 = vmatpush1.bf16.msra.mxu0 %v2870_v51  ;;  %581 = vperm.xlu0 %2724, %v515_v28   ;;  %v2025_v51 = vld [vmem:[%s3658_s4 + $0x8] sm:$0xff]  ;;  %v486_v28 = vld [vmem:[%s3655_s1 + $0x178] sm:$0xff] }
  0x82   : > { %1786 = vmatprep.subr.bf16.mxu0 %v2878_v52  ;;  %v458_v52 = vld [vmem:[%s3655_s1 + $0x98] sm:$0xff] }
  0x83   : > { %2567 = vmatpush1.bf16.msra.mxu1 %v3333_v13  ;;  %v2340_v11 = vcombine.low %v458_v52, %v462_v53 }
  0x84   : > { %1742 = vmatmul.mubr.bf16.gmra.mrb[24].mxu0 %v2368_v61  ;;  %586 = vperm.xlu1 %2725, %v516_v3   ;;  %v457_v61 = vld [vmem:[%s3655_s1 + $0x90] sm:$0xff] }
  0x85   : > { %1787 = vmatpush1.bf16.msra.mxu0 %v2876_v63  ;;  %1751 = vmatprep.mubr.bf16.mxu0 %v2377_v9  ;;  %v2330_v63 = vcombine.low %v449_v42, %v453_v43  ;;  %v2146_v9 = vld [vmem:[%s3659_s5 + $0x8] sm:$0xff]  ;;  %v442_v42 = vld [vmem:[%s3655_s1 + $0x18] sm:$0xff] }
  0x86   : > { %1788 = vmatprep.subr.bf16.mxu0 %v2884_v8  ;;  %1629 = vmatmul.mubr.bf16.gmra.mrb[24].mxu1 %v2366_v16  ;;  %v2339_v8 = vcombine.high %v457_v61, %v461_v62  ;;  %v465_v16 = vld [vmem:[%s3655_s1 + $0xd0] sm:$0xff]  ;;  %v446_v43 = vld [vmem:[%s3655_s1 + $0x38] sm:$0xff] }
  0x87   : > { %1638 = vmatprep.mubr.bf16.mxu1 %v2375_v19  ;;  %591 = vperm.xlu0 %2724, %v517_v36   ;;  %v2195_v19 = vld [vmem:[#allocation2] sm:$0x1]  ;;  %v2346_v23 = vcombine.low %v465_v16, %v469_v17  ;;  %v502_v36 = vld [vmem:[%s3655_s1 + $0x1f8] sm:$0xff] }
  0x88   : > { %596 = vperm.xlu1 %2725, %v518_v39  }
  0x89   : > { %1789 = vmatpush1.bf16.msra.mxu0 %v2882_v18  ;;  %v2338_v18 = vcombine.low %v457_v61, %v461_v62 }
  0x8a   : > { %1790 = vmatprep.subr.bf16.mxu0 %v2890_v21 }
  0x8b   : > { %2030 = vperm.xlu0 %2724, %v2024_v47   ;;  %v2324_v47 = vcombine.low %v442_v42, %v446_v43 }
  0x8c   : > { %1752 = vmatmul.mubr.bf16.gmra.mrb[28].mxu0 %v2376_v27  ;;  %2035 = vperm.xlu1 %2725, %v2025_v51  }
  0x8d   : > { %1791 = vmatpush1.bf16.msra.mxu0 %v2888_v29  ;;  %1794 = vmatprep.mubr.bf16.mxu0 %v2323_v2 }
  0x8e   : > { %1792 = vmatprep.subr.bf16.mxu0 %v2896_v31  ;;  %1639 = vmatmul.mubr.bf16.gmra.mrb[28].mxu1 %v2374_v35  ;;  %v494_v31 = vld [vmem:[%s3655_s1 + $0x1b8] sm:$0xff] }
  0x8f   : > { %2503 = vmatprep.mubr.msk.bf16.mxu1 %vm1511_vm0, %v2333_v38  ;;  %2040 = vperm.xlu0 %2724, %v2026_v55  }
  0x90   : > { %2045 = vperm.xlu1 %2725, %v2027_v58  }
  0x91   : > { %1793 = vmatpush1.bf16.msra.mxu0 %v2894_v37 }
  0x92   : > { %1875 = vmatprep.subr.bf16.mxu0 %v3110_v24  ;;  %v2341_v24 = vcombine.high %v458_v52, %v462_v53 }
  0x94   : > { %1795 = vmatmul.mubr.bf16.vlgmr.msra.gmra.mrb[0].mxu0 %v2322_v44  ;;  %2156 = vperm.xlu1 %2725, %v2146_v9  }
  0x95   : > { %1804 = vmatprep.mubr.bf16.mxu0 %v2331_v50  ;;  %1876 = vmatpush1.bf16.msra.mxu0 %v3124_v30  ;;  %v2145_v30 = vld [vmem:[%s3659_s5] sm:$0xff] }
  0x96   : > { %1877 = vmatprep.subr.bf16.mxu0 %v3128_v1  ;;  %1918 = vmatmul.mubr.bf16.vlgmr.msra.gmra.mrb[32].mxu1 %v2332_v54  ;;  %v466_v1 = vld [vmem:[%s3655_s1 + $0xd8] sm:$0xff] }
  0x97   : > { %2504 = vmatprep.mubr.msk.bf16.mxu1 %vm1511_vm0, %v2341_v24  ;;  %2151 = vperm.xlu0 %2724, %v2145_v30   ;;  %v2348_v21 = vcombine.low %v466_v1, %v470_v10 }
  0x98   : > { %2166 = vperm.xlu1 %2725, %v2148_v12   ;;  %v2931_v12 = vmov 0.0  }
  0x99   : > { %1878 = vmatpush1.bf16.msra.mxu0 %v3143_v5  ;;  %v2147_v5 = vld [vmem:[%s3659_s5 + $0x10] sm:$0xff] }
  0x9a   : > { %1879 = vmatprep.subr.bf16.mxu0 %v3147_v6  ;;  %v2349_v6 = vcombine.high %v466_v1, %v470_v10 }
  0x9b   : > { %2161 = vperm.xlu0 %2724, %v2147_v5  }
  0x9c   : > { %1805 = vmatmul.mubr.bf16.gmra.mrb[4].mxu0 %v2330_v63 }
  0x9d   : > { %1814 = vmatprep.mubr.bf16.mxu0 %v2339_v8  ;;  %1880 = vmatpush1.bf16.msra.mxu0 %v3159_v40  ;;  %v2347_v40 = vcombine.high %v465_v16, %v469_v17 }
  0x9e   : > { %1881 = vmatprep.subr.bf16.mxu0 %v3163_v41  ;;  %1928 = vmatmul.mubr.bf16.gmra.mrb[36].mxu1 %v2340_v11  ;;  %v478_v41 = vld [vmem:[%s3655_s1 + $0x138] sm:$0xff] }
  0x9f   : > { %2505 = vmatprep.mubr.msk.bf16.mxu1 %vm1511_vm0, %v2349_v6  ;;  %2198 = vperm.xlu0 %2724, %v2195_v19   ;;  %v2357_v22 = vcombine.high %v474_v20, %v478_v41  ;;  %v2356_v29 = vcombine.low %v474_v20, %v478_v41 }
  0xa1   : > { %1882 = vmatpush1.bf16.msra.mxu0 %v3175_v48  ;;  %v473_v48 = vld [vmem:[%s3655_s1 + $0x110] sm:$0xff] }
  0xa2   : > { %1883 = vmatprep.subr.bf16.mxu0 %v3179_v49  ;;  %v477_v49 = vld [vmem:[%s3655_s1 + $0x130] sm:$0xff] }
  0xa3   : > { %v2355_v27 = vcombine.high %v473_v48, %v477_v49  ;;  %v2354_v2 = vcombine.low %v473_v48, %v477_v49 }
  0xa4   : > { %1815 = vmatmul.mubr.bf16.gmra.mrb[8].mxu0 %v2338_v18 }
  0xa5   : > { %1824 = vmatprep.mubr.bf16.mxu0 %v2347_v40  ;;  %1884 = vmatpush1.bf16.msra.mxu0 %v3191_v56  ;;  %v482_v56 = vld [vmem:[%s3655_s1 + $0x158] sm:$0xff] }
  0xa6   : > { %1885 = vmatprep.subr.bf16.mxu0 %v3195_v57  ;;  %1938 = vmatmul.mubr.bf16.gmra.mrb[40].mxu1 %v2348_v21  ;;  %v2365_v57 = vcombine.high %v482_v56, %v486_v28  ;;  %v2364_v32 = vcombine.low %v482_v56, %v486_v28 }
  0xa7   : > { %2506 = vmatprep.mubr.msk.bf16.mxu1 %vm1511_vm0, %v2357_v22 }
  0xa9   : > { %1886 = vmatpush1.bf16.msra.mxu0 %v3207_v0  ;;  %v481_v0 = vld [vmem:[%s3655_s1 + $0x150] sm:$0xff] }
  0xaa   : > { %1887 = vmatprep.subr.bf16.mxu0 %v3211_v4  ;;  %v485_v4 = vld [vmem:[%s3655_s1 + $0x170] sm:$0xff] }
  0xab   : > { %v2363_v3 = vcombine.high %v481_v0, %v485_v4  ;;  %v2362_v33 = vcombine.low %v481_v0, %v485_v4 }
  0xac   : > { %1825 = vmatmul.mubr.bf16.gmra.mrb[12].mxu0 %v2346_v23 }
  0xad   : > { %1834 = vmatprep.mubr.bf16.mxu0 %v2355_v27  ;;  %1888 = vmatpush1.bf16.msra.mxu0 %v3223_v14  ;;  %v490_v14 = vld [vmem:[%s3655_s1 + $0x198] sm:$0xff] }
  0xae   : > { %1889 = vmatprep.subr.bf16.mxu0 %v3227_v15  ;;  %1948 = vmatmul.mubr.bf16.gmra.mrb[44].mxu1 %v2356_v29  ;;  %v2373_v15 = vcombine.high %v490_v14, %v494_v31  ;;  %v2372_v37 = vcombine.low %v490_v14, %v494_v31 }
  0xaf   : > { %2507 = vmatprep.mubr.msk.bf16.mxu1 %vm1511_vm0, %v2365_v57 }
  0xb1   : > { %1890 = vmatpush1.bf16.msra.mxu0 %v3245_v25  ;;  %v489_v25 = vld [vmem:[%s3655_s1 + $0x190] sm:$0xff] }
  0xb2   : > { %1891 = vmatprep.subr.bf16.mxu0 %v3249_v26  ;;  %v493_v26 = vld [vmem:[%s3655_s1 + $0x1b0] sm:$0xff]  ;;  %v3563_v56 = vpop.permute.xlu0 %521 }
  0xb3   : > { %v2371_v35 = vcombine.high %v489_v25, %v493_v26  ;;  %v2370_v38 = vcombine.low %v489_v25, %v493_v26 }
  0xb4   : > { %1835 = vmatmul.mubr.bf16.gmra.mrb[16].mxu0 %v2354_v2 }
  0xb5   : > { %1844 = vmatprep.mubr.bf16.mxu0 %v2363_v3  ;;  %1892 = vmatpush1.bf16.msra.mxu0 %v3267_v34  ;;  %v498_v34 = vld [vmem:[%s3655_s1 + $0x1d8] sm:$0xff] }
  0xb6   : > { %1893 = vmatprep.subr.bf16.mxu0 %v3271_v7  ;;  %1958 = vmatmul.mubr.bf16.gmra.mrb[48].mxu1 %v2364_v32  ;;  %v2381_v7 = vcombine.high %v498_v34, %v502_v36 }
  0xb7   : > { %2508 = vmatprep.mubr.msk.bf16.mxu1 %vm1511_vm0, %v2373_v15 }
  0xb9   : > { %1894 = vmatpush1.bf16.msra.mxu0 %v3289_v45  ;;  %v497_v45 = vld [vmem:[%s3655_s1 + $0x1d0] sm:$0xff] }
  0xba   : > { %1895 = vmatprep.subr.bf16.mxu0 %v3293_v46  ;;  %v501_v46 = vld [vmem:[%s3655_s1 + $0x1f0] sm:$0xff] }
  0xbb   : > { %v2379_v39 = vcombine.high %v497_v45, %v501_v46  ;;  %v2378_v44 = vcombine.low %v497_v45, %v501_v46 }
  0xbc   : > { %1845 = vmatmul.mubr.bf16.gmra.mrb[20].mxu0 %v2362_v33 }
  0xbd   : > { %1854 = vmatprep.mubr.bf16.mxu0 %v2371_v35  ;;  %1896 = vmatpush1.bf16.msra.mxu0 %v3311_v59  ;;  %v2380_v59 = vcombine.low %v498_v34, %v502_v36 }
  0xbe   : > { %1897 = vmatprep.subr.bf16.mxu0 %v3315_v60  ;;  %1968 = vmatmul.mubr.bf16.gmra.mrb[52].mxu1 %v2372_v37  ;;  %v2325_v60 = vcombine.high %v442_v42, %v446_v43 }
  0xbf   : > { %2509 = vmatprep.mubr.msk.bf16.mxu1 %vm1511_vm0, %v2381_v7 }
  0xc1   : > { %1898 = vmatpush1.bf16.msra.mxu0 %v3333_v13 }
  0xc4   : > { %1855 = vmatmul.mubr.bf16.gmra.mrb[24].mxu0 %v2370_v38 }
  0xc5   : > { %1864 = vmatprep.mubr.bf16.mxu0 %v2379_v39 }
  0xc6   : > { %1978 = vmatmul.mubr.bf16.gmra.mrb[56].mxu1 %v2380_v59 }
  0xc7   : > { %2112 = vmatprep.mubr.f32.mxu1 %v2931_v12 }
  0xcc   : > { %1865 = vmatmul.mubr.bf16.gmra.mrb[28].mxu0 %v2378_v44 }
  0xcd   : > { %2502 = vmatprep.mubr.msk.bf16.mxu0 %vm1511_vm0, %v2325_v60 }
  0xd4   : > { %1908 = vmatmul.mubr.bf16.vlgmr.msra.gmra.mrb[0].mxu0 %v2324_v47 }
  0xd7   : > { %v532_v27 = vpop.permute.xlu1 %531 }
  0xd8   : > { %v3565_v3 = vpop.permute.xlu0 %526 }
  0xdf   : > { %v537_v57 = vpop.permute.xlu1 %536 }
  0xe1   : > { %v542_v46 = vpop.permute.xlu0 %541 }
  0xe7   : > { %v547_v43 = vpop.permute.xlu1 %546 }
 0x129   : > { %v3512_v13 = vpop.f32.mrb[0].mxu1 }
 0x12a   : > { %v3514_v50 = vpop.f32.mrb[1].mxu1 }
 0x12b   : > { %v3516_v51 = vpop.f32.mrb[2].mxu1 }
 0x12c   : > { %v3518_v52 = vpop.f32.mrb[3].mxu1 }
 0x131   : > { %v1580_v53 = vpop.f32.mrb[4].mxu1 }
 0x132   : > { %v1582_v54 = vpop.f32.mrb[5].mxu1  ;;  %v1581_v4 = vadd.f32 %v1580_v53, %v532_v27 }
 0x133   : > { %v1584_v55 = vpop.f32.mrb[6].mxu1  ;;  %v1583_v14 = vadd.f32 %v1582_v54, %v532_v27 }
 0x134   : > { %v1586_v24 = vpop.f32.mrb[7].mxu1  ;;  %v1585_v32 = vadd.f32 %v1584_v55, %v537_v57 }
 0x135   : > { %v1587_v26 = vadd.f32 %v1586_v24, %v537_v57 }
 0x139   : > { %v1590_v58 = vpop.f32.mrb[8].mxu1 }
 0x13a   : > { %v1592_v61 = vpop.f32.mrb[9].mxu1  ;;  %v1591_v53 = vadd.f32 %v1590_v58, %v542_v46 }
 0x13b   : > { %v1594_v62 = vpop.f32.mrb[10].mxu1  ;;  %v1593_v27 = vadd.f32 %v1592_v61, %v542_v46 }
 0x13c   : > { %v3520_v63 = vpop.f32.mrb[11].mxu1 }
 0x141   : > { %v3522_v30 = vpop.f32.mrb[12].mxu1 }
 0x142   : > { %v3524_v8 = vpop.f32.mrb[13].mxu1 }
 0x143   : > { %v3526_v9 = vpop.f32.mrb[14].mxu1 }
 0x144   : > { %v3528_v1 = vpop.f32.mrb[15].mxu1 }
 0x149   : > { %v3530_v10 = vpop.f32.mrb[16].mxu1 }
 0x14a   : > { %v3532_v11 = vpop.f32.mrb[17].mxu1 }
 0x14b   : > { %v3534_v5 = vpop.f32.mrb[18].mxu1 }
 0x14c   : > { %v3536_v6 = vpop.f32.mrb[19].mxu1 }
 0x151   : > { %v3539_v16 = vpop.f32.mrb[20].mxu1 }
 0x152   : > { %v3541_v17 = vpop.f32.mrb[21].mxu1 }
 0x153   : > { %v3543_v18 = vpop.f32.mrb[22].mxu1 }
 0x154   : > { %v3545_v19 = vpop.f32.mrb[23].mxu1 }
 0x159   : > { %v3547_v40 = vpop.f32.mrb[24].mxu1 }
 0x15a   : > { %v3549_v20 = vpop.f32.mrb[25].mxu1 }
 0x15b   : > { %v3551_v41 = vpop.f32.mrb[26].mxu1 }
 0x15c   : > { %v3553_v21 = vpop.f32.mrb[27].mxu1 }
 0x161   : > { %v3555_v22 = vpop.f32.mrb[28].mxu1 }
 0x162   : > { %v3557_v48 = vpop.f32.mrb[29].mxu1 }
 0x163   : > { %v3559_v49 = vpop.f32.mrb[30].mxu1 }
 0x164   : > { %v3561_v23 = vpop.f32.mrb[31].mxu1 }
 0x169   : > { %v1919_v28 = vpop.f32.mrb[32].mxu1 }
 0x16a   : > { %v1921_v29 = vpop.f32.mrb[33].mxu1 }
 0x16b   : > { %v1923_v0 = vpop.f32.mrb[34].mxu1 }
 0x16c   : > { %v1925_v2 = vpop.f32.mrb[35].mxu1 }
 0x16f   : > { %v1806_v31 = vpop.f32.mrb[4].mxu0 }
 0x170   : > { %v2577_v15 = vadd.f32 %v1806_v31, %v1581_v4  ;;  %v1808_v25 = vpop.f32.mrb[5].mxu0 }
 0x171   : > { %v2580_v33 = vadd.f32 %v1808_v25, %v1583_v14  ;;  %v1810_v35 = vpop.f32.mrb[6].mxu0  ;;  %v1929_v38 = vpop.f32.mrb[36].mxu1 }
 0x172   : > { %v2583_v34 = vadd.f32 %v1810_v35, %v1585_v32  ;;  %v2578_v36 = vadd.f32 %v2577_v15, %v1919_v28  ;;  %v1812_v37 = vpop.f32.mrb[7].mxu0  ;;  %v1931_v59 = vpop.f32.mrb[37].mxu1  ;;  %v1595_v28 = vadd.f32 %v1594_v62, %v547_v43 }
 0x173   : > { %v2586_v7 = vadd.f32 %v1812_v37, %v1587_v26  ;;  %v2581_v45 = vadd.f32 %v2580_v33, %v1921_v29  ;;  %v1933_v44 = vpop.f32.mrb[38].mxu1  ;;  %v552_v35 = vpop.permute.xlu0 %551 }
 0x174   : > { %v2584_v39 = vadd.f32 %v2583_v34, %v1923_v0  ;;  %v1992_v60 = vmax.f32 %v2578_v36, 0.0  ;;  %v1935_v54 = vpop.f32.mrb[39].mxu1  ;;  %v1597_v0 = vadd.f32 %v3520_v63, %v547_v43 }
 0x175   : > { %v2587_v42 = vadd.f32 %v2586_v7, %v1925_v2  ;;  %v1993_v55 = vmax.f32 %v2581_v45, 0.0  ;;  %v557_v7 = vpop.permute.xlu1 %556 }
 0x176   : > { %v1994_v47 = vmax.f32 %v2584_v39, 0.0  ;;  %v1601_v39 = vadd.f32 %v3522_v30, %v552_v35 }
 0x177   : > { %v1995_v24 = vmax.f32 %v2587_v42, 0.0  ;;  %v1816_v57 = vpop.f32.mrb[8].mxu0 }
 0x178   : > { %v3567_v4 = vpack.c.bf16 %v1994_v47, %v1992_v60  ;;  %v2589_v14 = vadd.f32 %v1816_v57, %v1591_v53  ;;  %v1818_v29 = vpop.f32.mrb[9].mxu0  ;;  %v1603_v60 = vadd.f32 %v3524_v8, %v552_v35 }
 0x179   : > { %v3569_v31 = vpack.c.bf16 %v1995_v24, %v1993_v55  ;;  %v2592_v2 = vadd.f32 %v1818_v29, %v1593_v27  ;;  %v1820_v32 = vpop.f32.mrb[10].mxu0  ;;  %v1939_v34 = vpop.f32.mrb[40].mxu1 }
 0x17a   : > { %v2595_v15 = vadd.f32 %v1820_v32, %v1595_v28  ;;  %v2590_v25 = vadd.f32 %v2589_v14, %v1929_v38  ;;  %v1822_v26 = vpop.f32.mrb[11].mxu0  ;;  %v1941_v36 = vpop.f32.mrb[41].mxu1 }
 0x17b   : > { %v2598_v58 = vadd.f32 %v1822_v26, %v1597_v0  ;;  %v2593_v33 = vadd.f32 %v2592_v2, %v1931_v59  ;;  %v1943_v62 = vpop.f32.mrb[42].mxu1  ;;  %v1605_v59 = vadd.f32 %v3526_v9, %v557_v7  ;;  %v562_v0 = vpop.permute.xlu0 %561 }
 0x17c   : > { %v2596_v61 = vadd.f32 %v2595_v15, %v1933_v44  ;;  %v1996_v45 = vmax.f32 %v2590_v25, 0.0  ;;  %v1945_v42 = vpop.f32.mrb[43].mxu1  ;;  %v567_v25 = vpop.permute.xlu1 %566 }
 0x17d   : > { %v2599_v37 = vadd.f32 %v2598_v58, %v1935_v54  ;;  %v1997_v63 = vmax.f32 %v2593_v33, 0.0  ;;  %v1607_v54 = vadd.f32 %v3528_v1, %v557_v7  ;;  %v1611_v33 = vadd.f32 %v3530_v10, %v562_v0 }
 0x17e   : > { %v1998_v46 = vmax.f32 %v2596_v61, 0.0  ;;  %v1613_v61 = vadd.f32 %v3532_v11, %v562_v0 }
 0x17f   : > { %v1999_v43 = vmax.f32 %v2599_v37, 0.0  ;;  %v1826_v38 = vpop.f32.mrb[12].mxu0 }
 0x180   : > { %v3574_v47 = vpack.c.bf16 %v1998_v46, %v1996_v45  ;;  %v2601_v53 = vadd.f32 %v1826_v38, %v1601_v39  ;;  %v1828_v44 = vpop.f32.mrb[13].mxu0  ;;  %v1617_v39 = vadd.f32 %v3536_v6, %v567_v25  ;;  %v572_v38 = vpop.permute.xlu0 %571 }
 0x181   : > { %v3577_v55 = vpack.c.bf16 %v1999_v43, %v1997_v63  ;;  %v2604_v24 = vadd.f32 %v1828_v44, %v1603_v60  ;;  %v1830_v27 = vpop.f32.mrb[14].mxu0  ;;  %v1949_v8 = vpop.f32.mrb[44].mxu1  ;;  %v1623_v6 = vadd.f32 %v3541_v17, %v572_v38 }
 0x182   : > { %v2607_v57 = vadd.f32 %v1830_v27, %v1605_v59  ;;  %v2602_v30 = vadd.f32 %v2601_v53, %v1939_v34  ;;  %v1832_v28 = vpop.f32.mrb[15].mxu0  ;;  %v1951_v32 = vpop.f32.mrb[45].mxu1 }
 0x183   : > { %v2610_v14 = vadd.f32 %v1832_v28, %v1607_v54  ;;  %v2605_v29 = vadd.f32 %v2604_v24, %v1941_v36  ;;  %v1953_v9 = vpop.f32.mrb[46].mxu1  ;;  %v1615_v36 = vadd.f32 %v3534_v5, %v567_v25  ;;  %v577_v27 = vpop.permute.xlu1 %576 }
 0x184   : > { %v2608_v2 = vadd.f32 %v2607_v57, %v1943_v62  ;;  %v2000_v26 = vmax.f32 %v2602_v30, 0.0  ;;  %v1955_v35 = vpop.f32.mrb[47].mxu1  ;;  %v1621_v57 = vadd.f32 %v3539_v16, %v572_v38 }
 0x185   : > { %v2611_v15 = vadd.f32 %v2610_v14, %v1945_v42  ;;  %v2001_v1 = vmax.f32 %v2605_v29, 0.0 }
 0x186   : > { %v2002_v58 = vmax.f32 %v2608_v2, 0.0 }
 0x187   : > { %v2003_v37 = vmax.f32 %v2611_v15, 0.0  ;;  %v1836_v34 = vpop.f32.mrb[16].mxu0 }
 0x188   : > { %v3582_v7 = vpack.c.bf16 %v2002_v58, %v2000_v26  ;;  %v2613_v45 = vadd.f32 %v1836_v34, %v1611_v33  ;;  %v1838_v62 = vpop.f32.mrb[17].mxu0  ;;  %v1627_v26 = vadd.f32 %v3545_v19, %v577_v27 }
 0x189   : > { %v3585_v46 = vpack.c.bf16 %v2003_v37, %v2001_v1  ;;  %v2616_v42 = vadd.f32 %v1838_v62, %v1613_v61  ;;  %v1840_v63 = vpop.f32.mrb[18].mxu0  ;;  %v1959_v53 = vpop.f32.mrb[48].mxu1 }
 0x18a   : > { %v2619_v43 = vadd.f32 %v1840_v63, %v1615_v36  ;;  %v2614_v10 = vadd.f32 %v2613_v45, %v1949_v8  ;;  %v1842_v60 = vpop.f32.mrb[19].mxu0  ;;  %v1961_v54 = vpop.f32.mrb[49].mxu1 }
 0x18b   : > { %v2622_v59 = vadd.f32 %v1842_v60, %v1617_v39  ;;  %v2617_v11 = vadd.f32 %v2616_v42, %v1951_v32  ;;  %v1963_v5 = vpop.f32.mrb[50].mxu1  ;;  %v1625_v32 = vadd.f32 %v3543_v18, %v577_v27  ;;  %v582_v61 = vpop.permute.xlu0 %581 }
 0x18c   : > { %v2620_v44 = vadd.f32 %v2619_v43, %v1953_v9  ;;  %v2004_v30 = vmax.f32 %v2614_v10, 0.0  ;;  %v1965_v14 = vpop.f32.mrb[51].mxu1  ;;  %v587_v39 = vpop.permute.xlu1 %586  ;;  %v1631_v42 = vadd.f32 %v3547_v40, %v582_v61  ;;  %v1633_v19 = vadd.f32 %v3549_v20, %v582_v61 }
 0x18d   : > { %v2623_v24 = vadd.f32 %v2622_v59, %v1955_v35  ;;  %v2005_v29 = vmax.f32 %v2617_v11, 0.0  ;;  %v1637_v27 = vadd.f32 %v3553_v21, %v587_v39 }
 0x18e   : > { %v2006_v28 = vmax.f32 %v2620_v44, 0.0 }
 0x18f   : > { %v2007_v0 = vmax.f32 %v2623_v24, 0.0  ;;  %v1846_v8 = vpop.f32.mrb[20].mxu0 }
 0x190   : > { %v3590_v2 = vpack.c.bf16 %v2006_v28, %v2004_v30  ;;  %v2625_v15 = vadd.f32 %v1846_v8, %v1621_v57  ;;  %v1848_v25 = vpop.f32.mrb[21].mxu0 }
 0x191   : > { %v3593_v9 = vpack.c.bf16 %v2007_v0, %v2005_v29  ;;  %v2628_v58 = vadd.f32 %v1848_v25, %v1623_v6  ;;  %v1850_v16 = vpop.f32.mrb[22].mxu0  ;;  %v1969_v34 = vpop.f32.mrb[52].mxu1 }
 0x192   : > { %v2631_v33 = vadd.f32 %v1850_v16, %v1625_v32  ;;  %v2626_v35 = vadd.f32 %v2625_v15, %v1959_v53  ;;  %v1852_v1 = vpop.f32.mrb[23].mxu0  ;;  %v1971_v45 = vpop.f32.mrb[53].mxu1  ;;  %v1635_v53 = vadd.f32 %v3551_v41, %v587_v39 }
 0x193   : > { %v2634_v17 = vadd.f32 %v1852_v1, %v1627_v26  ;;  %v2629_v37 = vadd.f32 %v2628_v58, %v1961_v54  ;;  %v1973_v18 = vpop.f32.mrb[54].mxu1  ;;  %v597_v32 = vpop.permute.xlu1 %596 }
 0x194   : > { %v2632_v36 = vadd.f32 %v2631_v33, %v1963_v5  ;;  %v2008_v63 = vmax.f32 %v2626_v35, 0.0  ;;  %v1975_v10 = vpop.f32.mrb[55].mxu1  ;;  %v1645_v61 = vadd.f32 %v3559_v49, %v597_v32 }
 0x195   : > { %v2635_v62 = vadd.f32 %v2634_v17, %v1965_v14  ;;  %v2009_v60 = vmax.f32 %v2629_v37, 0.0  ;;  %v592_v14 = vpop.permute.xlu0 %591 }
 0x196   : > { %v2010_v43 = vmax.f32 %v2632_v36, 0.0  ;;  %v1641_v25 = vadd.f32 %v3555_v22, %v592_v14  ;;  %v1643_v21 = vadd.f32 %v3557_v48, %v592_v14  ;;  %v1647_v36 = vadd.f32 %v3561_v23, %v597_v32 }
 0x197   : > { %v2011_v38 = vmax.f32 %v2635_v62, 0.0  ;;  %v1856_v59 = vpop.f32.mrb[24].mxu0 }
 0x198   : > { %v3598_v11 = vpack.c.bf16 %v2010_v43, %v2008_v63  ;;  %v2637_v44 = vadd.f32 %v1856_v59, %v1631_v42  ;;  %v1858_v54 = vpop.f32.mrb[25].mxu0 }
 0x199   : > { %v3601_v24 = vpack.c.bf16 %v2011_v38, %v2009_v60  ;;  %v2640_v5 = vadd.f32 %v1858_v54, %v1633_v19  ;;  %v1860_v40 = vpop.f32.mrb[26].mxu0  ;;  %v1979_v29 = vpop.f32.mrb[56].mxu1  ;;  %v1571_v19 = vadd.f32 %v3512_v13, %v3563_v56  ;;  %v1573_v38 = vadd.f32 %v3514_v50, %v3563_v56 }
 0x19a   : > { %v2643_v57 = vadd.f32 %v1860_v40, %v1635_v53  ;;  %v2638_v30 = vadd.f32 %v2637_v44, %v1969_v34  ;;  %v1862_v28 = vpop.f32.mrb[27].mxu0  ;;  %v1981_v8 = vpop.f32.mrb[57].mxu1  ;;  %v1575_v44 = vadd.f32 %v3516_v51, %v3565_v3  ;;  %v1577_v40 = vadd.f32 %v3518_v52, %v3565_v3  ;;  %v2020_v51 = vld [vmem:[%s3657_s3] sm:$0xff]  ;;  %v2021_v52 = vld [vmem:[%s3657_s3 + $0x8] sm:$0xff]  ;;  %v2022_v3 = vld [vmem:[%s3657_s3 + $0x10] sm:$0xff] }
 0x19b   : > { %v2646_v20 = vadd.f32 %v1862_v28, %v1637_v27  ;;  %v2641_v6 = vadd.f32 %v2640_v5, %v1971_v45  ;;  %v1983_v41 = vpop.f32.mrb[58].mxu1 }
 0x19c   : > { %v2644_v0 = vadd.f32 %v2643_v57, %v1973_v18  ;;  %v2012_v26 = vmax.f32 %v2638_v30, 0.0  ;;  %v1985_v16 = vpop.f32.mrb[59].mxu1 }
 0x19d   : > { %v2647_v15 = vadd.f32 %v2646_v20, %v1975_v10  ;;  %v2013_v33 = vmax.f32 %v2641_v6, 0.0 }
 0x19e   : > { %v2014_v58 = vmax.f32 %v2644_v0, 0.0 }
 0x19f   : > { %v2015_v35 = vmax.f32 %v2647_v15, 0.0  ;;  %v1866_v1 = vpop.f32.mrb[28].mxu0 }
 0x1a0   : > { %v2538_v17 = vpack.c.bf16 %v2014_v58, %v2012_v26  ;;  %v2649_v37 = vadd.f32 %v1866_v1, %v1641_v25  ;;  %v1868_v34 = vpop.f32.mrb[29].mxu0 }
 0x1a1   : > { %v2536_v45 = vpack.c.bf16 %v2015_v35, %v2013_v33  ;;  %v2652_v62 = vadd.f32 %v1868_v34, %v1643_v21  ;;  %v1870_v39 = vpop.f32.mrb[30].mxu0 }
 0x1a2   : > { %v2655_v18 = vadd.f32 %v1870_v39, %v1645_v61  ;;  %v2650_v22 = vadd.f32 %v2649_v37, %v1979_v29  ;;  %v1872_v42 = vpop.f32.mrb[31].mxu0 }
 0x1a3   : > { %v2658_v63 = vadd.f32 %v1872_v42, %v1647_v36  ;;  %v2653_v43 = vadd.f32 %v2652_v62, %v1981_v8 }
 0x1a4   : > { %v2656_v10 = vadd.f32 %v2655_v18, %v1983_v41  ;;  %v2016_v60 = vmax.f32 %v2650_v22, 0.0 }
 0x1a5   : > { %v2659_v48 = vadd.f32 %v2658_v63, %v1985_v16  ;;  %v2017_v59 = vmax.f32 %v2653_v43, 0.0 }
 0x1a6   : > { %v2018_v49 = vmax.f32 %v2656_v10, 0.0 }
 0x1a7   : > { %v2019_v23 = vmax.f32 %v2659_v48, 0.0  ;;  %v1909_v53 = vpop.f32.mrb[0].mxu0 }
 0x1a8   : > { %v2542_v54 = vpack.c.bf16 %v2018_v49, %v2016_v60  ;;  %v2569_v27 = vadd.f32 %v1909_v53, %v1571_v19  ;;  %v1911_v5 = vpop.f32.mrb[1].mxu0 }
 0x1a9   : > { %v2540_v57 = vpack.c.bf16 %v2019_v23, %v2017_v59  ;;  %v2571_v30 = vadd.f32 %v1911_v5, %v1573_v38  ;;  %v1913_v13 = vpop.f32.mrb[2].mxu0 }
 0x1aa   : > { %v2573_v28 = vadd.f32 %v1913_v13, %v1575_v44  ;;  %v1915_v14 = vpop.f32.mrb[3].mxu0  ;;  %v1988_v6 = vmax.f32 %v2569_v27, 0.0 }
 0x1ab   : > { %v2575_v20 = vadd.f32 %v1915_v14, %v1577_v40  ;;  %v1989_v56 = vmax.f32 %v2571_v30, 0.0 }
 0x1ac   : > { %v1990_v50 = vmax.f32 %v2573_v28, 0.0 }
 0x1ad   : > { %v1991_v29 = vmax.f32 %v2575_v20, 0.0  ;;  %v2932_v20 = vmov 1966171168  }
 0x1ae   : > { %v2514_v0 = vpack.c.bf16 %v1990_v50, %v1988_v6  ;;  %v2211_v6 = vunpack.c.l.s4 %v2932_v20 }
 0x1af   : > { %v2512_v8 = vpack.c.bf16 %v1991_v29, %v1989_v56 }
 0x1b1   : > { %2513 = vmatprep.subr.bf16.mxu1 %v2512_v8 }
 0x1b2   : > { %2515 = vmatpush1.bf16.msra.mxu1 %v2514_v0 }
 0x1b3   : > { %2517 = vmatprep.subr.bf16.mxu1 %v3569_v31  ;;  %v2031_v31 = vpop.permute.xlu0 %2030 }
 0x1b6   : > { %2519 = vmatpush1.bf16.msra.mxu1 %v3567_v4  ;;  %v2023_v4 = vld [vmem:[%s3657_s3 + $0x18] sm:$0xff] }
 0x1b7   : > { %2521 = vmatprep.subr.bf16.mxu1 %v3577_v55  ;;  %v2041_v55 = vpop.permute.xlu0 %2040 }
 0x1ba   : > { %2523 = vmatpush1.bf16.msra.mxu1 %v3574_v47  ;;  %v2036_v47 = vpop.permute.xlu1 %2035 }
 0x1bb   : > { %2525 = vmatprep.subr.bf16.mxu1 %v3585_v46  ;;  %v2152_v25 = vpop.permute.xlu0 %2151 }
 0x1be   : > { %2527 = vmatpush1.bf16.msra.mxu1 %v3582_v7 }
 0x1bf   : > { %2529 = vmatprep.subr.bf16.mxu1 %v3593_v9  ;;  %v2046_v9 = vpop.permute.xlu1 %2045  ;;  %v2162_v39 = vpop.permute.xlu0 %2161 }
 0x1c2   : > { %2531 = vmatpush1.bf16.msra.mxu1 %v3590_v2 }
 0x1c3   : > { %2533 = vmatprep.subr.bf16.mxu1 %v3601_v24  ;;  %v2157_v16 = vpop.permute.xlu1 %2156  ;;  %v2199_v0 = vpop.permute.xlu0 %2198 }
 0x1c6   : > { %2535 = vmatpush1.bf16.msra.mxu1 %v3598_v11 }
 0x1c7   : > { %2537 = vmatprep.subr.bf16.mxu1 %v2536_v45  ;;  %v2167_v38 = vpop.permute.xlu1 %2166 }
 0x1ca   : > { %2539 = vmatpush1.bf16.msra.mxu1 %v2538_v17 }
 0x1cb   : > { %2541 = vmatprep.subr.bf16.mxu1 %v2540_v57 }
 0x1ce   : > { %2543 = vmatpush1.bf16.msra.mxu1 %v2542_v54  ;;  %v2201_v54 = vlaneseq }
 0x1d0   : > { %v2202_v30 = vshrl.u32 %v2201_v54, 7  ;;  %vm2227_vm1 = vcmp.lt.s32.totalorder %v2201_v54, 256 }
 0x1d1   : > { %2113 = vmatmul.mubr.f32.vlgmr.msra.gmra.mrb[60].mxu1 %v2020_v51 }
 0x1d2   : > { %2118 = vmatprep.mubr.f32.mxu1 %v2931_v12  ;;  %v2203_v56 = vsub.s32 0, %v2202_v30 }
 0x1d5   : > { %2119 = vmatmul.mubr.f32.gmra.mrb[62].mxu1 %v2021_v52  ;;  %v2212_v52 = vunpack.c.0.s8 %v2211_v6 }
 0x1d6   : > { %2124 = vmatprep.mubr.f32.mxu1 %v2931_v12 }
 0x1d9   : > { %2125 = vmatmul.mubr.f32.gmra.mrb[64].mxu1 %v2022_v3 }
 0x1da   : > { %2130 = vmatprep.mubr.f32.mxu1 %v2931_v12 }
 0x1dd   : > { %2131 = vmatmul.mubr.f32.gmra.mrb[66].mxu1 %v2023_v4  ;;  %v2204_v4 = vrot.slane %v2199_v0, %v2203_v56 }
 0x2a4   : > { %v2114_v7 = vpop.f32.mrb[60].mxu1 }
 0x2a5   : > { %v2115_v46 = vadd.f32 %v2114_v7, %v2031_v31  ;;  %v2116_v2 = vpop.f32.mrb[61].mxu1  ;;  %v2215_v7 = vsub.s32 %v2212_v52, %v2202_v30 }
 0x2a6   : > { %v2117_v11 = vadd.f32 %v2116_v2, %v2031_v31 }
 0x2a7   : > { %v2137_v32 = vmax.f32 %v2115_v46, 0.0 }
 0x2a8   : > { %v2120_v24 = vpop.f32.mrb[62].mxu1  ;;  %v2138_v26 = vmax.f32 %v2117_v11, 0.0 }
 0x2a9   : > { %v2121_v15 = vadd.f32 %v2120_v24, %v2036_v47  ;;  %v2122_v41 = vpop.f32.mrb[63].mxu1  ;;  %v2169_v35 = vmul.f32 %v2152_v25, %v2137_v32 }
 0x2aa   : > { %v2123_v12 = vadd.f32 %v2122_v41, %v2036_v47  ;;  %v2170_v37 = vmul.f32 %v2152_v25, %v2138_v26 }
 0x2ab   : > { %v2139_v58 = vmax.f32 %v2121_v15, 0.0 }
 0x2ac   : > { %v2140_v21 = vmax.f32 %v2123_v12, 0.0  ;;  %v2126_v33 = vpop.f32.mrb[64].mxu1 }
 0x2ad   : > { %v2171_v1 = vmul.f32 %v2157_v16, %v2139_v58  ;;  %v2127_v61 = vadd.f32 %v2126_v33, %v2041_v55  ;;  %v2128_v17 = vpop.f32.mrb[65].mxu1 }
 0x2ae   : > { %v2172_v34 = vmul.f32 %v2157_v16, %v2140_v21  ;;  %v2129_v36 = vadd.f32 %v2128_v17, %v2041_v55 }
 0x2af   : > { %v2177_v45 = vadd.f32 %v2171_v1, %v2169_v35  ;;  %v2141_v62 = vmax.f32 %v2127_v61, 0.0 }
 0x2b0   : > { %v2186_v18 = vadd.f32 %v2172_v34, %v2170_v37  ;;  %v2142_v22 = vmax.f32 %v2129_v36, 0.0  ;;  %v2132_v42 = vpop.f32.mrb[66].mxu1 }
 0x2b1   : > { %v2173_v63 = vmul.f32 %v2162_v39, %v2141_v62  ;;  %v2133_v43 = vadd.f32 %v2132_v42, %v2046_v9  ;;  %v2134_v10 = vpop.f32.mrb[67].mxu1 }
 0x2b2   : > { %v2174_v48 = vmul.f32 %v2162_v39, %v2142_v22  ;;  %v2135_v19 = vadd.f32 %v2134_v10, %v2046_v9 }
 0x2b3   : > { %v2178_v60 = vadd.f32 %v2177_v45, %v2173_v63  ;;  %v2143_v49 = vmax.f32 %v2133_v43, 0.0 }
 0x2b4   : > { %v2187_v59 = vadd.f32 %v2186_v18, %v2174_v48  ;;  %v2144_v23 = vmax.f32 %v2135_v19, 0.0 }
 0x2b5   : > { %v2175_v53 = vmul.f32 %v2167_v38, %v2143_v49 }
 0x2b6   : > { %v2176_v44 = vmul.f32 %v2167_v38, %v2144_v23 }
 0x2b7   : > { %v2179_v27 = vadd.f32 %v2178_v60, %v2175_v53 }
 0x2b8   : > { %v2188_v5 = vadd.f32 %v2187_v59, %v2176_v44 }
 0x2b9   : > { %v2180_v40 = vrot.slane %v2179_v27, 4 }
 0x2ba   : > { %v2189_v57 = vrot.slane %v2188_v5, 4 }
 0x2bb   : > { %v2181_v13 = vadd.f32 %v2180_v40, %v2179_v27 }
 0x2bc   : > { %v2190_v28 = vadd.f32 %v2189_v57, %v2188_v5 }
 0x2bd   : > { %v2182_v14 = vrot.slane %v2181_v13, 2 }
 0x2be   : > { %v2191_v50 = vrot.slane %v2190_v28, 2 }
 0x2bf   : > { %v2183_v29 = vadd.f32 %v2182_v14, %v2181_v13 }
 0x2c0   : > { %v2192_v8 = vadd.f32 %v2191_v50, %v2190_v28 }
 0x2c1   : > { %v2184_v51 = vrot.slane %v2183_v29, 1 }
 0x2c2   : > { %v2193_v3 = vrot.slane %v2192_v8, 1 }
 0x2c3   : > { %v2185_v31 = vadd.f32 %v2184_v51, %v2183_v29 }
 0x2c4   : > { %v2194_v47 = vadd.f32 %v2193_v3, %v2192_v8 }
 0x2c5   : > { %v2205_v55 = vadd.f32 %v2204_v4, %v2185_v31 }
 0x2c6   : > { %v2206_v46 = vadd.f32 %v2204_v4, %v2194_v47 }
 0x2c8   : > { %v2209_v2 = vcombine.low %v2205_v55, %v2206_v46 }
 0x2ca   : > { %v2216_v9 = vrot.slane %v2209_v2, %v2215_v7 }
 0x2cc   : > { %v2223_v11 = vrot.slane %v2216_v9, %v2215_v7 }
 0x2ce   : > { %2229 = vst.msk [vmem:[%s316_s22] sm:$0x3] %vm2227_vm1, %v2223_v11 }
 0x2cf PF: > { %s19_s28 = sadd.s32 1, %s2928_s28   ;;  %s3662_s26 = smov %s2924_s27 }
 0x2d0   : > { %p16_p5 = scmp.ge.s32.totalorder %s19_s28, 4   ;;  %s3663_s27 = smov %s3665_s6 }
 0x2d2   :  { %18 = sbr.rel (!%p16_p5) target bundleno = 3 (0x3), region = 78 }

</bundles_post_ra>
